<compile_context>
chip_gen: v6e
topology: v6e:2x2x1
jax: 0.10.0
libtpu: 0.0.40
codegen_flags: <defaults>
</compile_context>

<pallas_src>
import functools

import jax
import jax.numpy as jnp
from jax import lax
from jax.experimental import pallas as pl
from jax.experimental.pallas import tpu as pltpu

_BN_EPS = 1e-5


@functools.lru_cache(maxsize=1)
def _vmem_budgets():
    """Generation-aware (scoped VMEM limit, per-step block budget) in bytes."""
    cap = 64 * 1024 * 1024                       # conservative fallback (v7x per-TC)
    try:
        cap = int(pltpu.get_tpu_info().vmem_capacity_bytes)
    except Exception:
        pass
    limit = max(32 << 20, min(int(cap * 0.80), cap - (8 << 20), 100 << 20))
    budget = max(16 << 20, int(cap * 0.50))
    return limit, budget


def _round8(n):
    return max(8, (n // 8) * 8)


# ---------------------------------------------------------------------------
# Kernel 1: pointwise 1x1 conv + folded-BN bias.
#   x:(R, Cin) @ w:(Cin, Cout) + b:(1, Cout), channels on lanes.
# ---------------------------------------------------------------------------
def _pw_kernel(x_ref, w_ref, b_ref, o_ref):
    acc = jnp.dot(x_ref[...], w_ref[...], preferred_element_type=jnp.float32)
    o_ref[...] = (acc + b_ref[...].astype(jnp.float32)).astype(o_ref.dtype)


def _pointwise(x, w, b):
    rows, cin = x.shape
    cout = w.shape[1]
    itemsize = jnp.dtype(x.dtype).itemsize
    vmem_limit, budget = _vmem_budgets()

    # Largest row tile whose double-buffered in/out blocks fit the budget,
    # capped at 1024 (HBM roofline ~85% at 512-1024 rows), multiple of 8.
    tm = budget // max(1, 2 * (cin + cout) * itemsize)
    tm = _round8(max(8, min(1024, tm)))
    if rows >= 16 and pl.cdiv(rows, tm) < 2:      # keep >= 2 steps when possible
        tm = _round8(rows // 2)
    tm = min(tm, rows)

    grid = (pl.cdiv(rows, tm),)
    cost = pl.CostEstimate(
        flops=2 * rows * cin * cout,
        transcendentals=0,
        bytes_accessed=itemsize * (rows * (cin + cout) + cin * cout + cout))

    return pl.pallas_call(
        _pw_kernel,
        out_shape=jax.ShapeDtypeStruct((rows, cout), x.dtype),
        grid_spec=pl.GridSpec(
            grid=grid,
            in_specs=[
                pl.BlockSpec((tm, cin), lambda i: (i, 0)),
                # TODO(synk): pipeline_mode=pl.Buffered(1) for the two
                # grid-invariant operands below (frees VMEM at large C, v7x).
                pl.BlockSpec((cin, cout), lambda i: (0, 0)),
                pl.BlockSpec((1, cout), lambda i: (0, 0)),
            ],
            out_specs=pl.BlockSpec((tm, cout), lambda i: (i, 0))),
        compiler_params=pltpu.CompilerParams(
            dimension_semantics=("parallel",),
            vmem_limit_bytes=vmem_limit),
        cost_estimate=cost,
    )(x, w, b.reshape(1, cout))


# ---------------------------------------------------------------------------
# Kernel 2: fused SK attention + final 1x1 conv + shortcut + residual.
#   Per image (pre-activation branch features f_m, BN scale folded into conv):
#     fr_m = relu(f_m + bbr_m)
#     s    = sum_m mean_HW(fr_m)                       (== mean_HW(sum_m fr_m))
#     z    = relu(s @ wfc + bfc)
#     att  = softmax_m(z @ wfcs_m + bfcs_m)
#     v    = sum_m att_m * fr_m                         (fr_m recomputed, not held)
#     out  = v @ w_eff + b_eff + (x @ wsc + bsc | x)    (BN3/conv2/BN4 + shortcut)
# ---------------------------------------------------------------------------
def _sk_fused_kernel(*refs, num_branches, has_sc_conv):
    feat_refs = refs[:num_branches]
    idx = num_branches
    x_ref = refs[idx]; idx += 1
    bbr_ref = refs[idx]; idx += 1
    wfc_ref = refs[idx]; idx += 1
    bfc_ref = refs[idx]; idx += 1
    wfcs_ref = refs[idx]; idx += 1
    bfcs_ref = refs[idx]; idx += 1
    weff_ref = refs[idx]; idx += 1
    beff_ref = refs[idx]; idx += 1
    if has_sc_conv:
        wsc_ref = refs[idx]; idx += 1
        bsc_ref = refs[idx]; idx += 1
    o_ref = refs[idx]

    bbr = bbr_ref[...].astype(jnp.float32)                 # (M, C)
    c = bbr.shape[1]

    def branch(m):                                         # relu(feats_m + bn_bias_m)
        f = feat_refs[m][...].astype(jnp.float32)          # (Bb, HW, C)
        return jnp.maximum(f + bbr[m].reshape(1, 1, c), 0.0)

    # ---- pass 1: global average pool of the branch sum -----------------------
    s = jnp.mean(branch(0), axis=1)                        # (Bb, C)
    for m in range(1, num_branches):
        s = s + jnp.mean(branch(m), axis=1)

    # ---- squeeze: fc (+BN+ReLU); all M fcs as one wide matmul ----------------
    z = jnp.dot(s, wfc_ref[...].astype(jnp.float32),
                preferred_element_type=jnp.float32)
    z = jnp.maximum(z + bfc_ref[...].astype(jnp.float32), 0.0)        # (Bb, d)
    logits_all = jnp.dot(z, wfcs_ref[...].astype(jnp.float32),
                         preferred_element_type=jnp.float32)          # (Bb, M*C)
    bfcs = bfcs_ref[...].astype(jnp.float32)                          # (M, C)
    logits = [logits_all[:, m * c:(m + 1) * c] + bfcs[m].reshape(1, c)
              for m in range(num_branches)]

    # ---- softmax over the branch axis -----------------------------------------
    mmax = logits[0]
    for m in range(1, num_branches):
        mmax = jnp.maximum(mmax, logits[m])
    exps = [jnp.exp(l - mmax) for l in logits]
    denom = exps[0]
    for m in range(1, num_branches):
        denom = denom + exps[m]
    inv = pl.reciprocal(denom, approx=True)                           # (Bb, C) on EUP

    # ---- pass 2: recompute branches, attention-weighted sum -------------------
    acc = (exps[0] * inv)[:, None, :] * branch(0)
    for m in range(1, num_branches):
        acc = acc + (exps[m] * inv)[:, None, :] * branch(m)           # (Bb, HW, C)

    # ---- epilogue: final 1x1 conv (BN3/BN4 folded) + shortcut + residual ------
    bb_, hw_, _ = acc.shape
    out = jnp.dot(acc.reshape(bb_ * hw_, c), weff_ref[...].astype(jnp.float32),
                  preferred_element_type=jnp.float32)
    out = out + beff_ref[...].astype(jnp.float32)                     # (Bb*HW, Cout)
    xv = x_ref[...].astype(jnp.float32)
    xv = xv.reshape(bb_ * hw_, xv.shape[-1])
    if has_sc_conv:
        sc = jnp.dot(xv, wsc_ref[...].astype(jnp.float32),
                     preferred_element_type=jnp.float32)
        sc = sc + bsc_ref[...].astype(jnp.float32)
    else:
        sc = xv                                                       # Cin == Cout
    o_ref[...] = (out + sc).reshape(bb_, hw_, -1).astype(o_ref.dtype)


def _sk_fused(branch_feats, x3, bbr, wfc, bfc, wfcs_all, bfcs,
              w_eff, b_eff, wsc=None, bsc=None, *, num_branches):
    batch, hw, c = branch_feats[0].shape
    cin = x3.shape[-1]
    cout = w_eff.shape[-1]
    d = wfc.shape[-1]
    has_sc_conv = wsc is not None
    itemsize = jnp.dtype(branch_feats[0].dtype).itemsize
    vmem_limit, budget = _vmem_budgets()

    # Per-image VMEM: double-buffered I/O blocks + live f32 temporaries
    # (one recomputed branch + the accumulator + the epilogue out/shortcut).
    per_img = (2 * hw * (num_branches * c + cin + cout) * itemsize
               + hw * (2 * c + 2 * cout) * 4)
    bb = max(1, min(batch, budget // max(per_img, 1)))
    # >= 4 grid steps when batch allows (2 per v7x TensorCore), else >= 2.
    if batch >= 4 and pl.cdiv(batch, bb) < 4:
        bb = max(1, batch // 4)
    elif batch >= 2 and pl.cdiv(batch, bb) < 2:
        bb = max(1, batch // 2)
    grid = (pl.cdiv(batch, bb),)
    # TODO(synk): if a single image (bb=1) exceeds the budget (huge HW*C), an
    # HW-tiled two-sweep variant (pool sweep + gate sweep) is needed.

    feat_spec = pl.BlockSpec((bb, hw, c), lambda i: (i, 0, 0))
    in_specs = [feat_spec] * num_branches + [
        pl.BlockSpec((bb, hw, cin), lambda i: (i, 0, 0)),
        # TODO(synk): pipeline_mode=pl.Buffered(1) for the grid-invariant
        # weights below would free VMEM at large channel counts (v7x).
        pl.BlockSpec((num_branches, c), lambda i: (0, 0)),
        pl.BlockSpec((c, d), lambda i: (0, 0)),
        pl.BlockSpec((1, d), lambda i: (0, 0)),
        pl.BlockSpec((d, num_branches * c), lambda i: (0, 0)),
        pl.BlockSpec((num_branches, c), lambda i: (0, 0)),
        pl.BlockSpec((c, cout), lambda i: (0, 0)),
        pl.BlockSpec((1, cout), lambda i: (0, 0)),
    ]
    args = list(branch_feats) + [x3, bbr, wfc, bfc.reshape(1, d), wfcs_all,
                                 bfcs, w_eff, b_eff.reshape(1, cout)]
    if has_sc_conv:
        in_specs += [pl.BlockSpec((cin, cout), lambda i: (0, 0)),
                     pl.BlockSpec((1, cout), lambda i: (0, 0))]
        args += [wsc, bsc.reshape(1, cout)]

    kernel = functools.partial(_sk_fused_kernel, num_branches=num_branches,
                               has_sc_conv=has_sc_conv)
    flops = (7 * batch * hw * c * num_branches
             + 2 * batch * c * d * (num_branches + 1)
             + 2 * batch * hw * c * cout
             + (2 * batch * hw * cin * cout if has_sc_conv else batch * hw * cout))
    weight_bytes = 4 * (2 * num_branches * c + c * d + d + d * num_branches * c
                        + c * cout + cout
                        + (cin * cout + cout if has_sc_conv else 0))
    cost = pl.CostEstimate(
        flops=int(flops),
        transcendentals=int(batch * num_branches * c),
        bytes_accessed=int(itemsize * batch * hw * (num_branches * c + cin + cout)
                           + weight_bytes))

    return pl.pallas_call(
        kernel,
        out_shape=jax.ShapeDtypeStruct((batch, hw, cout), branch_feats[0].dtype),
        grid_spec=pl.GridSpec(
            grid=grid,
            in_specs=in_specs,
            out_specs=pl.BlockSpec((bb, hw, cout), lambda i: (i, 0, 0))),
        compiler_params=pltpu.CompilerParams(
            dimension_semantics=("parallel",),
            vmem_limit_bytes=vmem_limit),
        cost_estimate=cost,
    )(*args)


# ---------------------------------------------------------------------------
# Wrapper: SKUnit forward (stride=1), NCHW in / NCHW out, BN in eval mode.
# ---------------------------------------------------------------------------
def _bn_scale_bias(bn, eps=_BN_EPS):
    gamma, beta, mean, var = bn
    scale = gamma / jnp.sqrt(var + eps)
    return scale, beta - mean * scale


def sk_unit_forward(x, params, *, num_branches, groups):
    """x: (B, Cin, H, W).  Returns (B, Cout, H, W)."""
    # TODO(synk): stride != 1 (strided branch convs + strided shortcut) not implemented.
    # TODO(synk): in a stacked network, hoist the NCHW<->NHWC transposes below to the
    # network boundary so consecutive SKUnits stay NHWC end-to-end (saves 2 HBM passes).
    b_, cin, h, w_sp = x.shape
    hw = h * w_sp
    mid = params['conv1_w'].shape[0]
    cout = params['conv2_w'].shape[0]

    x_nhwc = jnp.transpose(x, (0, 2, 3, 1))               # NHWC: channels on lanes
    x_flat = x_nhwc.reshape(b_ * hw, cin)

    # ---- feas[0:2]: 1x1 conv (Cin->mid) + BN, folded -----------------------------
    s2, t2 = _bn_scale_bias(params['bn2'])
    w1 = (params['conv1_w'] * s2[:, None]).T               # (Cin, mid)
    b1 = s2 * params['conv1_b'] + t2
    h_flat = _pointwise(x_flat, w1, b1)
    h_nhwc = h_flat.reshape(b_, h, w_sp, mid)

    # ---- SKConv branch convs (grouped, dilated 3x3), BN scale folded -------------
    # TODO(synk): grouped dilated 3x3 conv stays on XLA conv_general_dilated (no Pallas impl).
    branch_feats, branch_bias = [], []
    for i in range(num_branches):
        sb, tb = _bn_scale_bias(params['branch_bn'][i])
        wb = params['branch_w'][i] * sb[:, None, None, None]
        wb_hwio = jnp.transpose(wb, (2, 3, 1, 0))           # (3, 3, mid//G, mid)
        y = lax.conv_general_dilated(
            h_nhwc, wb_hwio, window_strides=(1, 1),
            padding=[(1 + i, 1 + i), (1 + i, 1 + i)],
            rhs_dilation=(1 + i, 1 + i),
            dimension_numbers=('NHWC', 'HWIO', 'NHWC'),
            feature_group_count=groups)
        branch_feats.append(y.reshape(b_, hw, mid))         # fed separately, no concat
        branch_bias.append(tb)
    bbr = jnp.stack(branch_bias, axis=0)                    # (M, mid)

    # ---- squeeze/excite params (BN folded), final conv + shortcut params ---------
    sfc, tfc = _bn_scale_bias(params['fc_bn'])
    wfc = (params['fc_w'] * sfc[:, None]).T                 # (mid, d)
    wfcs_all = jnp.concatenate(
        [params['fcs_w'][m].T for m in range(num_branches)], axis=1)   # (d, M*mid)
    bfcs = jnp.stack([params['fcs_b'][m] for m in range(num_branches)], 0)  # (M, mid)

    s3, t3 = _bn_scale_bias(params['bn3'])
    s4, t4 = _bn_scale_bias(params['bn4'])
    w2 = params['conv2_w']                                   # (Cout, mid)
    w_eff = (w2 * s4[:, None] * s3[None, :]).T                # (mid, Cout)
    b_eff = s4 * (w2 @ t3 + params['conv2_b']) + t4

    if 'sc_w' in params:
        ssc, tsc = _bn_scale_bias(params['sc_bn'])
        wsc = (params['sc_w'] * ssc[:, None]).T               # (Cin, Cout)
        bsc = ssc * params['sc_b'] + tsc
    else:
        wsc = bsc = None                                      # identity shortcut

    # ---- fused SK attention + final 1x1 conv + shortcut + residual ---------------
    out3 = _sk_fused(branch_feats, x_nhwc.reshape(b_, hw, cin), bbr,
                     wfc, tfc, wfcs_all, bfcs, w_eff, b_eff, wsc, bsc,
                     num_branches=num_branches)               # (B, HW, Cout)
    return jnp.transpose(out3.reshape(b_, h, w_sp, cout), (0, 3, 1, 2))


# ---------------------------------------------------------------------------
# Pure-JAX reference mirroring the PyTorch SKUnit.forward (eval-mode BN).
# ---------------------------------------------------------------------------
def _bn_ref(t, bn, eps=_BN_EPS):
    gamma, beta, mean, var = bn
    shape = (1, -1) + (1,) * (t.ndim - 2)
    scale = gamma / jnp.sqrt(var + eps)
    return (t - mean.reshape(shape)) * scale.reshape(shape) + beta.reshape(shape)


def sk_unit_ref(x, p, *, num_branches, groups, eps=_BN_EPS):
    h = jnp.einsum('bihw,oi->bohw', x, p['conv1_w']) + p['conv1_b'][None, :, None, None]
    h = _bn_ref(h, p['bn2'], eps)
    feats = []
    for i in range(num_branches):
        y = lax.conv_general_dilated(
            h, p['branch_w'][i], window_strides=(1, 1),
            padding=[(1 + i, 1 + i), (1 + i, 1 + i)],
            rhs_dilation=(1 + i, 1 + i),
            dimension_numbers=('NCHW', 'OIHW', 'NCHW'),
            feature_group_count=groups)
        feats.append(jnp.maximum(_bn_ref(y, p['branch_bn'][i], eps), 0.0))
    feats = jnp.stack(feats, axis=1)                          # (B, M, C, H, W)
    u = feats.sum(axis=1)
    s = u.mean(axis=(2, 3))                                   # (B, C)
    z = s @ p['fc_w'].T
    g, be, mu, var = p['fc_bn']
    z = jnp.maximum((z - mu) * (g / jnp.sqrt(var + eps)) + be, 0.0)
    att = jnp.stack([z @ p['fcs_w'][m].T + p['fcs_b'][m]
                     for m in range(num_branches)], axis=1)   # (B, M, C)
    att = jax.nn.softmax(att, axis=1)
    v = (feats * att[:, :, :, None, None]).sum(axis=1)
    v = _bn_ref(v, p['bn3'], eps)
    v = jnp.einsum('bihw,oi->bohw', v, p['conv2_w']) + p['conv2_b'][None, :, None, None]
    v = _bn_ref(v, p['bn4'], eps)
    if 'sc_w' in p:
        sc = jnp.einsum('bihw,oi->bohw', x, p['sc_w']) + p['sc_b'][None, :, None, None]
        sc = _bn_ref(sc, p['sc_bn'], eps)
    else:
        sc = x
    return v + sc


if __name__ == "__main__":
    # Full-precision f32 matmuls/convs so the Pallas path and reference agree tightly.
    jax.config.update("jax_default_matmul_precision", "highest")

    B, H, W = 2, 16, 16
    in_features, out_features = 32, 64
    mid = out_features // 2            # 32
    M, G, r, L = 2, 8, 16, 32
    d = max(mid // r, L)               # 32

    ks = iter(jax.random.split(jax.random.PRNGKey(0), 64))

    def randn(shape, scale=0.1):
        return scale * jax.random.normal(next(ks), shape, dtype=jnp.float32)

    def bn_params(c):
        return (1.0 + 0.1 * jax.random.normal(next(ks), (c,), jnp.float32),  # gamma
                0.1 * jax.random.normal(next(ks), (c,), jnp.float32),        # beta
                0.1 * jax.random.normal(next(ks), (c,), jnp.float32),        # running mean
                0.5 + jax.random.uniform(next(ks), (c,), jnp.float32))       # running var

    params = {
        'conv1_w': randn((mid, in_features)), 'conv1_b': randn((mid,)),
        'bn2': bn_params(mid),
        'branch_w': [randn((mid, mid // G, 3, 3)) for _ in range(M)],
        'branch_bn': [bn_params(mid) for _ in range(M)],
        'fc_w': randn((d, mid)), 'fc_bn': bn_params(d),
        'fcs_w': [randn((mid, d)) for _ in range(M)],
        'fcs_b': [randn((mid,)) for _ in range(M)],
        'bn3': bn_params(mid),
        'conv2_w': randn((out_features, mid)), 'conv2_b': randn((out_features,)),
        'bn4': bn_params(out_features),
        # in_features != out_features -> conv + BN shortcut
        'sc_w': randn((out_features, in_features)), 'sc_b': randn((out_features,)),
        'sc_bn': bn_params(out_features),
    }
    x = jax.random.normal(next(ks), (B, in_features, H, W), dtype=jnp.float32)

    out = sk_unit_forward(x, params, num_branches=M, groups=G)
    out = jax.block_until_ready(out)

    ref = sk_unit_ref(x, params, num_branches=M, groups=G)
    assert out.shape == (B, out_features, H, W)
    assert jnp.allclose(out, ref, atol=1e-2, rtol=1e-2), "mismatch vs reference"

    print("KERNEL_OK")
</pallas_src>

<mosaic_0001>
module attributes {stable_mosaic.version = 11 : i64} {
  func.func @_pw_kernel(%arg0: i32, %arg1: memref<256x32xf32, #tpu.memory_space<vmem>>, %arg2: memref<32x32xf32, #tpu.memory_space<vmem>>, %arg3: memref<1x32xf32, #tpu.memory_space<vmem>>, %arg4: memref<256x32xf32, #tpu.memory_space<vmem>>) attributes {dimension_semantics = [#tpu.dimension_semantics<parallel>], iteration_bounds = array<i64: 2>, scalar_prefetch = 0 : i64, scratch_operands = 0 : i64, tpu.core_type = #tpu.core_type<tc>, window_params = [{transform_indices = @transform_0, window_bounds = array<i64: 256, 32>}, {pipeline_mode = #tpu.pipeline_mode<synchronous>, transform_indices = @transform_1, window_bounds = array<i64: 32, 32>}, {pipeline_mode = #tpu.pipeline_mode<synchronous>, transform_indices = @transform_2, window_bounds = array<i64: 1, 32>}, {transform_indices = @transform_3, window_bounds = array<i64: 256, 32>}]} {
    %c0 = arith.constant 0 : index
    %c0_0 = arith.constant 0 : index
    %0 = vector.load %arg1[%c0, %c0_0] : memref<256x32xf32, #tpu.memory_space<vmem>>, vector<256x32xf32>
    %c0_1 = arith.constant 0 : index
    %c0_2 = arith.constant 0 : index
    %1 = vector.load %arg2[%c0_1, %c0_2] : memref<32x32xf32, #tpu.memory_space<vmem>>, vector<32x32xf32>
    %cst = arith.constant dense<0.000000e+00> : vector<256x32xf32>
    %2 = tpu.matmul %0, %1, %cst {dimension_numbers = #tpu.dot_dimension_numbers<[1], [0], [0], [1], [0, 0, 1, 1], [], []>, precision = #tpu.contract_precision<fp32>} : vector<256x32xf32>, vector<32x32xf32>, vector<256x32xf32> -> vector<256x32xf32>
    %c0_3 = arith.constant 0 : index
    %c0_4 = arith.constant 0 : index
    %3 = vector.load %arg3[%c0_3, %c0_4] : memref<1x32xf32, #tpu.memory_space<vmem>>, vector<1x32xf32>
    %4 = vector.broadcast %3 : vector<1x32xf32> to vector<256x32xf32>
    %5 = arith.addf %2, %4 : vector<256x32xf32>
    %c0_5 = arith.constant 0 : index
    %c0_6 = arith.constant 0 : index
    %6 = vector.load %arg4[%c0_5, %c0_6] : memref<256x32xf32, #tpu.memory_space<vmem>>, vector<256x32xf32>
    tpu.vector_store %arg4[%c0_5, %c0_6], %5 {strides = array<i32>} : memref<256x32xf32, #tpu.memory_space<vmem>>, vector<256x32xf32>,
    return
  }
  func.func @transform_0(%arg0: i32) -> (i32, i32) {
    %c0_i32 = arith.constant 0 : i32
    %c0_i32_0 = arith.constant 0 : i32
    return %arg0, %c0_i32 : i32, i32
  }
  func.func @transform_1(%arg0: i32) -> (i32, i32) {
    %c0_i32 = arith.constant 0 : i32
    %c0_i32_0 = arith.constant 0 : i32
    %c0_i32_1 = arith.constant 0 : i32
    return %c0_i32, %c0_i32_0 : i32, i32
  }
  func.func @transform_2(%arg0: i32) -> (i32, i32) {
    %c0_i32 = arith.constant 0 : i32
    %c0_i32_0 = arith.constant 0 : i32
    %c0_i32_1 = arith.constant 0 : i32
    return %c0_i32, %c0_i32_0 : i32, i32
  }
  func.func @transform_3(%arg0: i32) -> (i32, i32) {
    %c0_i32 = arith.constant 0 : i32
    %c0_i32_0 = arith.constant 0 : i32
    return %arg0, %c0_i32 : i32, i32
  }
}

</mosaic_0001>

<bundles_post_ra>
// kernel: tpu_custom_call.1
= control target key start
LH: loop header
LB: loop body
LE: loop exit
PB: predicated region body
PF: predicated region fallthrough
CT: control target
= control target key end

     0   :  { %s2820_s12 = smov 0   ;;  %s3864_s0 = inlined_call_operand.vmem [shape: f32[512,32], index: 0, kind: input, shape index: {}]   ;;  %s3865_s1 = inlined_call_operand.vmem [shape: f32[32,32], index: 1, kind: input, shape index: {}]   ;;  %s3866_s2 = inlined_call_operand.vmem [shape: f32[1,32], index: 2, kind: input, shape index: {}]   ;;  %s3867_s3 = inlined_call_operand.vmem [shape: f32[512,32], index: 3, kind: output, shape index: {}]  }
   0x1 LB: > { %s2220_s13 = sadd.s32 4294967295, %s2798_s12   ;;  %p2224_p0 = scmp.ge.s32.totalorder %s2798_s12, 1  ;;  %s2798_s12 = sphi %s2820_s12, %s13_s12  }
   0x2   : > { %p138_p1 = scmp.lt.s32.totalorder %s2798_s12, 3 }
   0x4   : > { %p139_p2 = pnand %p2224_p0, %p138_p1 }
   0x6   : > { %142 = sbr.rel (%p139_p2) target bundleno = 419 (0x1a3), region = 32 }
   0xb   : > { %v209_v0 = vld [vmem:[%s3865_s1 + $0x18] sm:$0xff]  ;;  %v208_v1 = vld [vmem:[%s3865_s1 + $0x10] sm:$0xff]  ;;  %v207_v2 = vld [vmem:[%s3865_s1 + $0x8] sm:$0xff]  ;;  %s2225_s20 = sshll.u32 %s2220_s13, 5  ;;  %vm217_vm0 = vcmask 261120  }
   0xc   : > { %v2837_v3 = vand.u32 4294901760, %v209_v0  ;;  %v2839_v4 = vand.u32 4294901760, %v208_v1  ;;  %v2841_v5 = vand.u32 4294901760, %v207_v2  ;;  %v206_v6 = vld [vmem:[%s3865_s1] sm:$0xff]  ;;  %p163_p3 = scmp.lt.s32.totalorder %s2225_s20, 63 }
   0xd   : > { %v2846_v7 = vand.u32 4294901760, %v206_v6 }
   0xe   : > { %2448 = vmatprep.subr.mxu0 %v2837_v3  ;;  %v2850_v8 = vsub.f32 %v209_v0, %v2837_v3  ;;  %v2853_v9 = vsub.f32 %v208_v1, %v2839_v4  ;;  %v2856_v10 = vsub.f32 %v207_v2, %v2841_v5  ;;  %s4089_s20 = smov (!%p163_p3, %s2225_s20), 63 }
   0xf   : > { %2449 = vmatpush3.msra.mxu0 %v2837_v3  ;;  %v2862_v11 = vsub.f32 %v206_v6, %v2846_v7  ;;  %s2226_s23 = sshll.u32 %s4089_s20, 3 }
  0x10   : > { %v2865_v12 = vand.u32 4294901760, %v2850_v8  ;;  %2450 = vmatprep.subr.mxu0 %v2839_v4  ;;  %v2869_v13 = vand.u32 4294901760, %v2853_v9  ;;  %v2872_v14 = vand.u32 4294901760, %v2856_v10  ;;  %s2884_s26 = scalar_lea.vmem %s3864_s0, %s2226_s23  ;;  %s3709_s4 = scalar_lea.vmem %s3867_s3, %s2226_s23 }
  0x11   : > { %2451 = vmatpush3.msra.mxu0 %v2839_v4  ;;  %v2877_v15 = vand.u32 4294901760, %v2862_v11  ;;  %v174_v19 = vld [vmem:[%s2884_s26] sm:$0xff]  ;;  %v175_v20 = vld [vmem:[%s2884_s26 + $0x8] sm:$0xff]  ;;  %v176_v21 = vld [vmem:[%s2884_s26 + $0x10] sm:$0xff] }
  0x12   : > { %v731_v16 = vsub.f32 %v2850_v8, %v2865_v12  ;;  %v738_v17 = vsub.f32 %v2853_v9, %v2869_v13  ;;  %2452 = vmatprep.subr.mxu0 %v2841_v5  ;;  %v745_v18 = vsub.f32 %v2856_v10, %v2872_v14  ;;  %v219_v23 = vsel %vm217_vm0, %v174_v19, 0  ;;  %v177_v26 = vld [vmem:[%s2884_s26 + $0x18] sm:$0xff]  ;;  %v178_v27 = vld [vmem:[%s2884_s26 + $0x20] sm:$0xff]  ;;  %v179_v28 = vld [vmem:[%s2884_s26 + $0x28] sm:$0xff] }
  0x13   : > { %2453 = vmatpush3.msra.mxu0 %v2841_v5  ;;  %v752_v22 = vsub.f32 %v2862_v11, %v2877_v15  ;;  %v222_v24 = vsel %vm217_vm0, %v175_v20, 0  ;;  %v225_v25 = vsel %vm217_vm0, %v176_v21, 0  ;;  %v2906_v32 = vand.u32 4294901760, %v219_v23  ;;  %v180_v37 = vld [vmem:[%s2884_s26 + $0x30] sm:$0xff]  ;;  %v181_v38 = vld [vmem:[%s2884_s26 + $0x38] sm:$0xff]  ;;  %v182_v63 = vld [vmem:[%s2884_s26 + $0x40] sm:$0xff] }
  0x14   : > { %v732_v29 = vand.u32 4294901760, %v731_v16  ;;  %v739_v30 = vand.u32 4294901760, %v738_v17  ;;  %v746_v31 = vand.u32 4294901760, %v745_v18  ;;  %2454 = vmatprep.subr.mxu0 %v2846_v7  ;;  %v2909_v34 = vand.u32 4294901760, %v222_v24  ;;  %v183_v16 = vld [vmem:[%s2884_s26 + $0x48] sm:$0xff]  ;;  %v184_v21 = vld [vmem:[%s2884_s26 + $0x50] sm:$0xff] }
  0x15   : > { %2455 = vmatpush3.msra.mxu0 %v2846_v7  ;;  %v753_v33 = vand.u32 4294901760, %v752_v22  ;;  %v2911_v35 = vand.u32 4294901760, %v225_v25  ;;  %v228_v36 = vsel %vm217_vm0, %v177_v26, 0  ;;  %v2917_v39 = vsub.f32 %v219_v23, %v2906_v32  ;;  %2512 = vmatprep.mubr.f32.mxu1 %v2906_v32  ;;  %v186_v26 = vld [vmem:[%s2884_s26 + $0x60] sm:$0xff] }
  0x16   : > { %3927 = vst [vmem:[#allocation2_spill] sm:$0xff] %v2909_v34  ;;  %2504 = vmatprep.subr.mxu1 %v732_v29  ;;  %v2920_v40 = vand.u32 4294901760, %v228_v36  ;;  %v231_v41 = vsel %vm217_vm0, %v178_v27, 0  ;;  %v234_v42 = vsel %vm217_vm0, %v179_v28, 0  ;;  %2560 = vmatprep.subr.mxu0 %v2850_v8  ;;  %v2926_v43 = vsub.f32 %v222_v24, %v2909_v34 }
  0x17   : > { %3928 = vst [vmem:[#allocation3_spill] sm:$0xff] %v2911_v35  ;;  %2505 = vmatpush3.msra.mxu1 %v732_v29  ;;  %v2929_v44 = vsub.f32 %v225_v25, %v2911_v35  ;;  %v2931_v45 = vand.u32 4294901760, %v231_v41  ;;  %v2933_v46 = vand.u32 4294901760, %v234_v42  ;;  %v3881_v47 = vand.u32 4294901760, %v2917_v39  ;;  %v185_v25 = vld [vmem:[%s2884_s26 + $0x58] sm:$0xff] }
  0x18   : > { %3929 = vst [vmem:[#allocation4_spill] sm:$0xff] %v2920_v40  ;;  %2506 = vmatprep.subr.mxu1 %v739_v30  ;;  %v2937_v48 = vsub.f32 %v228_v36, %v2920_v40  ;;  %v237_v49 = vsel %vm217_vm0, %v180_v37, 0  ;;  %v240_v50 = vsel %vm217_vm0, %v181_v38, 0  ;;  %v3879_v51 = vand.u32 4294901760, %v2926_v43  ;;  %v187_v38 = vld [vmem:[%s2884_s26 + $0x68] sm:$0xff] }
  0x19   : > { %3930 = vst [vmem:[#allocation5_spill] sm:$0xff] %v2931_v45  ;;  %3931 = vst [vmem:[#allocation6_spill] sm:$0xff] %v2933_v46  ;;  %2507 = vmatpush3.msra.mxu1 %v739_v30  ;;  %v3877_v52 = vand.u32 4294901760, %v2929_v44  ;;  %v2944_v53 = vsub.f32 %v231_v41, %v2931_v45  ;;  %v2947_v54 = vsub.f32 %v234_v42, %v2933_v46  ;;  %v2953_v57 = vand.u32 4294901760, %v237_v49 }
  0x1a   : > { %2508 = vmatprep.subr.mxu1 %v746_v31  ;;  %v386_v55 = vsub.f32 %v2917_v39, %v3881_v47  ;;  %v3876_v56 = vand.u32 4294901760, %v2937_v48  ;;  %v2955_v58 = vand.u32 4294901760, %v240_v50  ;;  %v396_v59 = vsub.f32 %v2926_v43, %v3879_v51 }
  0x1b   : > { %3932 = vst [vmem:[#allocation7_spill] sm:$0xff] %v2953_v57  ;;  %2509 = vmatpush3.msra.mxu1 %v746_v31  ;;  %v406_v60 = vsub.f32 %v2929_v44, %v3877_v52  ;;  %v3875_v61 = vand.u32 4294901760, %v2944_v53  ;;  %v3874_v62 = vand.u32 4294901760, %v2947_v54  ;;  %v2970_v2 = vsub.f32 %v237_v49, %v2953_v57 }
  0x1c   : > { %3933 = vst [vmem:[#allocation8_spill] sm:$0xff] %v2955_v58  ;;  %2510 = vmatprep.subr.mxu1 %v753_v33  ;;  %v387_v0 = vand.u32 4294901760, %v386_v55  ;;  %v416_v1 = vsub.f32 %v2937_v48, %v3876_v56  ;;  %v2973_v6 = vsub.f32 %v240_v50, %v2955_v58  ;;  %v397_v17 = vand.u32 4294901760, %v396_v59  ;;  %v188_v50 = vld [vmem:[%s2884_s26 + $0x70] sm:$0xff] }
  0x1d   : > { %2511 = vmatpush3.msra.mxu1 %v753_v33  ;;  %v407_v18 = vand.u32 4294901760, %v406_v60  ;;  %v426_v19 = vsub.f32 %v2944_v53, %v3875_v61  ;;  %v436_v20 = vsub.f32 %v2947_v54, %v3874_v62  ;;  %v3873_v22 = vand.u32 4294901760, %v2970_v2 }
  0x1e   : > { %2456 = vmatprep.mubr.f32.mxu0 %v387_v0  ;;  %2513 = vmatmul.mubr.f32.vlgmr.msra.gmra.mxu1 %v2909_v34  ;;  %v3872_v23 = vand.u32 4294901760, %v2973_v6  ;;  %v243_v24 = vsel %vm217_vm0, %v182_v63, 0  ;;  %v417_v27 = vand.u32 4294901760, %v416_v1  ;;  %v246_v30 = vsel %vm217_vm0, %v183_v16, 0 }
  0x1f   : > { %2457 = vmatmul.mubr.f32.vlgmr.msra.gmra.mxu0 %v397_v17  ;;  %2616 = vmatprep.subr.mxu1 %v2837_v3  ;;  %v427_v28 = vand.u32 4294901760, %v426_v19  ;;  %v2990_v29 = vand.u32 4294901760, %v243_v24  ;;  %v437_v31 = vand.u32 4294901760, %v436_v20  ;;  %v446_v33 = vsub.f32 %v2970_v2, %v3873_v22 }
  0x20   : > { %2561 = vmatpush3.msra.mxu0 %v2850_v8  ;;  %2617 = vmatpush3.msra.mxu1 %v2837_v3  ;;  %v2998_v36 = vand.u32 4294901760, %v246_v30  ;;  %v249_v37 = vsel %vm217_vm0, %v184_v21, 0  ;;  %v252_v8 = vsel %vm217_vm0, %v185_v25, 0  ;;  %v255_v49 = vsel %vm217_vm0, %v186_v26, 0 }
  0x21   : > { %3934 = vst [vmem:[#allocation9_spill] sm:$0xff] %v2990_v29  ;;  %2459 = vmatprep.mubr.f32.mxu0 %v407_v18  ;;  %2515 = vmatprep.mubr.f32.mxu1 %v2911_v35  ;;  %v3004_v41 = vsub.f32 %v243_v24, %v2990_v29  ;;  %v3006_v42 = vand.u32 4294901760, %v249_v37  ;;  %v447_v55 = vand.u32 4294901760, %v446_v33  ;;  %v456_v59 = vsub.f32 %v2973_v6, %v3872_v23  ;;  %v189_v18 = vld [vmem:[%s2884_s26 + $0x78] sm:$0xff]  ;;  %v194_v23 = vld [vmem:[%s2884_s26 + $0xa0] sm:$0xff] }
  0x22   : > { %3935 = vst [vmem:[#allocation10_spill] sm:$0xff] %v2998_v36  ;;  %2516 = vmatmul.mubr.f32.gmra.mxu1 %v2920_v40  ;;  %2562 = vmatprep.subr.mxu0 %v2853_v9  ;;  %v3017_v60 = vsub.f32 %v246_v30, %v2998_v36  ;;  %v3019_v63 = vand.u32 4294901760, %v252_v8  ;;  %v3026_v16 = vand.u32 4294901760, %v255_v49  ;;  %v258_v17 = vsel %vm217_vm0, %v187_v38, 0 }
  0x23   : > { %3936 = vst [vmem:[#allocation11_spill] sm:$0xff] %v3006_v42  ;;  %2460 = vmatmul.mubr.f32.gmra.mxu0 %v417_v27  ;;  %2518 = vmatprep.mubr.f32.mxu1 %v2931_v45  ;;  %v3870_v0 = vand.u32 4294901760, %v3004_v41  ;;  %v3024_v1 = vsub.f32 %v249_v37, %v3006_v42  ;;  %v3035_v21 = vand.u32 4294901760, %v258_v17  ;;  %v261_v24 = vsel %vm217_vm0, %v188_v50, 0  ;;  %v190_v37 = vld [vmem:[%s2884_s26 + $0x80] sm:$0xff]  ;;  %v204_v45 = vld [vmem:[%s2884_s26 + $0xf0] sm:$0xff] }
  0x24   : > { %3937 = vst [vmem:[#allocation12_spill] sm:$0xff] %v3019_v63  ;;  %3938 = vst [vmem:[#allocation13_spill] sm:$0xff] %v3026_v16  ;;  %2462 = vmatprep.mubr.f32.mxu0 %v427_v28  ;;  %v3869_v19 = vand.u32 4294901760, %v3017_v60  ;;  %2563 = vmatpush3.msra.mxu0 %v2853_v9  ;;  %v3033_v20 = vsub.f32 %v252_v8, %v3019_v63  ;;  %v3044_v27 = vsub.f32 %v255_v49, %v3026_v16 }
  0x25   : > { %3939 = vst [vmem:[#allocation14_spill] sm:$0xff] %v3035_v21  ;;  %v466_v25 = vsub.f32 %v3004_v41, %v3870_v0  ;;  %2618 = vmatprep.subr.mxu1 %v2839_v4  ;;  %v3868_v26 = vand.u32 4294901760, %v3024_v1  ;;  %v3046_v28 = vand.u32 4294901760, %v261_v24  ;;  %2564 = vmatprep.subr.mxu0 %v2856_v10  ;;  %v3052_v30 = vsub.f32 %v258_v17, %v3035_v21  ;;  %v191_v17 = vld [vmem:[%s2884_s26 + $0x88] sm:$0xff] }
  0x26   : > { %2519 = vmatmul.mubr.f32.gmra.mxu1 %v2933_v46  ;;  %v3871_v9 = vand.u32 4294901760, %v3033_v20  ;;  %v264_v33 = vsel %vm217_vm0, %v189_v18, 0  ;;  %2565 = vmatpush3.msra.mxu0 %v2856_v10  ;;  %v457_v38 = vand.u32 4294901760, %v456_v59  ;;  %v476_v8 = vsub.f32 %v3017_v60, %v3869_v19  ;;  %v192_v18 = vld [vmem:[%s2884_s26 + $0x90] sm:$0xff]  ;;  %v203_v46 = vld [vmem:[%s2884_s26 + $0xe8] sm:$0xff] }
  0x27   : > { %3940 = vst [vmem:[#allocation15_spill] sm:$0xff] %v3046_v28  ;;  %2463 = vmatmul.mubr.f32.gmra.mxu0 %v437_v31  ;;  %2521 = vmatprep.mubr.f32.mxu1 %v2953_v57  ;;  %v3062_v49 = vsub.f32 %v261_v24, %v3046_v28  ;;  %v467_v50 = vand.u32 4294901760, %v466_v25  ;;  %v486_v10 = vsub.f32 %v3024_v1, %v3868_v26  ;;  %v3878_v31 = vand.u32 4294901760, %v3044_v27  ;;  %v201_v57 = vld [vmem:[%s2884_s26 + $0xd8] sm:$0xff] }
  0x28   : > { %2465 = vmatprep.mubr.f32.mxu0 %v447_v55  ;;  %2619 = vmatpush3.msra.mxu1 %v2839_v4  ;;  %v3069_v59 = vand.u32 4294901760, %v264_v33  ;;  %v496_v24 = vsub.f32 %v3033_v20, %v3871_v9  ;;  %v267_v55 = vsel %vm217_vm0, %v190_v37, 0  ;;  %v3880_v25 = vand.u32 4294901760, %v3052_v30  ;;  %v193_v9 = vld [vmem:[%s2884_s26 + $0x98] sm:$0xff] }
  0x29   : > { %2620 = vmatprep.subr.mxu1 %v2841_v5  ;;  %2566 = vmatprep.subr.mxu0 %v2862_v11  ;;  %v3882_v26 = vand.u32 4294901760, %v3062_v49  ;;  %v3085_v0 = vand.u32 4294901760, %v267_v55  ;;  %v477_v37 = vand.u32 4294901760, %v476_v8  ;;  %v270_v22 = vsel %vm217_vm0, %v191_v17, 0 }
  0x2a   : > { %3941 = vst [vmem:[#allocation16_spill] sm:$0xff] %v3069_v59  ;;  %2522 = vmatmul.mubr.f32.gmra.mxu1 %v2955_v58  ;;  %v3083_v19 = vsub.f32 %v264_v33, %v3069_v59  ;;  %2567 = vmatpush3.msra.mxu0 %v2862_v11  ;;  %v273_v62 = vsel %vm217_vm0, %v192_v18, 0  ;;  %v487_v61 = vand.u32 4294901760, %v486_v10  ;;  %v506_v33 = vsub.f32 %v3044_v27, %v3878_v31  ;;  %v195_v11 = vld [vmem:[%s2884_s26 + $0xa8] sm:$0xff] }
  0x2b   : > { %3942 = vst [vmem:[#allocation17_spill] sm:$0xff] %v3085_v0  ;;  %2466 = vmatmul.mubr.f32.gmra.mxu0 %v457_v38  ;;  %2524 = vmatprep.mubr.f32.mxu1 %v2990_v29  ;;  %v3097_v56 = vsub.f32 %v267_v55, %v3085_v0  ;;  %v3099_v52 = vand.u32 4294901760, %v270_v22  ;;  %v196_v38 = vld [vmem:[%s2884_s26 + $0xb0] sm:$0xff]  ;;  %v3104_v8 = vand.u32 4294901760, %v273_v62  ;;  %v276_v17 = vsel %vm217_vm0, %v193_v9, 0 }
  0x2c   : > { %2468 = vmatprep.mubr.f32.mxu0 %v467_v50  ;;  %2621 = vmatpush3.msra.mxu1 %v2841_v5  ;;  %v279_v50 = vsel %vm217_vm0, %v194_v23, 0  ;;  %v497_v10 = vand.u32 4294901760, %v496_v24  ;;  %v516_v18 = vsub.f32 %v3052_v30, %v3880_v25  ;;  %v526_v55 = vsub.f32 %v3062_v49, %v3882_v26 }
  0x2d   : > { %3943 = vst [vmem:[#allocation18_spill] sm:$0xff] %v3099_v52  ;;  %3944 = vst [vmem:[#allocation19_spill] sm:$0xff] %v3104_v8  ;;  %2622 = vmatprep.subr.mxu1 %v2846_v7  ;;  %2672 = vmatprep.subr.mxu0 %v2865_v12  ;;  %v3120_v23 = vsub.f32 %v270_v22, %v3099_v52  ;;  %v3122_v31 = vand.u32 4294901760, %v276_v17  ;;  %v282_v24 = vsel %vm217_vm0, %v195_v11, 0  ;;  %v285_v51 = vsel %vm217_vm0, %v196_v38, 0  ;;  %v198_v22 = vld [vmem:[%s2884_s26 + $0xc0] sm:$0xff] }
  0x2e   : > { %2525 = vmatmul.mubr.f32.gmra.mxu1 %v2998_v36  ;;  %v507_v25 = vand.u32 4294901760, %v506_v33  ;;  %v3128_v26 = vsub.f32 %v273_v62, %v3104_v8  ;;  %v3130_v9 = vand.u32 4294901760, %v279_v50  ;;  %v517_v11 = vand.u32 4294901760, %v516_v18 }
  0x2f   : > { %2469 = vmatmul.mubr.f32.gmra.mxu0 %v477_v37  ;;  %2527 = vmatprep.mubr.f32.mxu1 %v3006_v42  ;;  %v197_v37 = vld [vmem:[%s2884_s26 + $0xb8] sm:$0xff]  ;;  %v527_v38 = vand.u32 4294901760, %v526_v55  ;;  %v3139_v33 = vand.u32 4294901760, %v285_v51  ;;  %v3947_v62 = vand.u32 4294901760, %v3083_v19  ;;  %v3901_v42 = vand.u32 4294901760, %v3120_v23 }
  0x30   : > { %2471 = vmatprep.mubr.f32.mxu0 %v487_v61  ;;  %3945 = vst [vmem:[#allocation20_spill] sm:$0xff] %v3130_v9  ;;  %2623 = vmatpush3.msra.mxu1 %v2846_v7  ;;  %v3137_v61 = vand.u32 4294901760, %v282_v24  ;;  %v3147_v36 = vsub.f32 %v276_v17, %v3122_v31  ;;  %v288_v18 = vsel %vm217_vm0, %v197_v37, 0  ;;  %v3948_v55 = vand.u32 4294901760, %v3097_v56 }
  0x31   : > { %2728 = vmatprep.subr.mxu1 %v2837_v3  ;;  %3946 = vst [vmem:[#allocation21_spill] sm:$0xff] %v3139_v33  ;;  %v536_v47 = vsub.f32 %v3083_v19, %v3947_v62  ;;  %v291_v29 = vsel %vm217_vm0, %v198_v22, 0  ;;  %v199_v62 = vld [vmem:[%s2884_s26 + $0xc8] sm:$0xff]  ;;  %v3166_v37 = vand.u32 4294901760, %v288_v18  ;;  %v556_v22 = vsub.f32 %v3120_v23, %v3901_v42 }
  0x32   : > { %2528 = vmatmul.mubr.f32.gmra.mxu1 %v3019_v63  ;;  %v546_v63 = vsub.f32 %v3097_v56, %v3948_v55  ;;  %v3161_v17 = vsub.f32 %v282_v24, %v3137_v61  ;;  %v200_v55 = vld [vmem:[%s2884_s26 + $0xd0] sm:$0xff]  ;;  %v3174_v24 = vand.u32 4294901760, %v291_v29 }
  0x33   : > { %2472 = vmatmul.mubr.f32.gmra.mxu0 %v497_v10  ;;  %2530 = vmatprep.mubr.f32.mxu1 %v3026_v16  ;;  %v3155_v16 = vsub.f32 %v279_v50, %v3130_v9  ;;  %v537_v50 = vand.u32 4294901760, %v536_v47  ;;  %v297_v47 = vsel %vm217_vm0, %v200_v55, 0 }
  0x34   : > { %2474 = vmatprep.mubr.f32.mxu0 %v507_v25  ;;  %v3164_v25 = vsub.f32 %v285_v51, %v3139_v33  ;;  %v3949_v51 = vand.u32 4294901760, %v3128_v26 }
  0x36   : > { %2531 = vmatmul.mubr.f32.gmra.mxu1 %v3035_v21  ;;  %v547_v21 = vand.u32 4294901760, %v546_v63  ;;  %v566_v58 = vsub.f32 %v3128_v26, %v3949_v51  ;;  %v3187_v63 = vsub.f32 %v288_v18, %v3166_v37  ;;  %v557_v51 = vand.u32 4294901760, %v556_v22 }
  0x37   : > { %2475 = vmatmul.mubr.f32.gmra.mxu0 %v517_v11  ;;  %2533 = vmatprep.mubr.f32.mxu1 %v3046_v28  ;;  %v294_v28 = vsel %vm217_vm0, %v199_v62, 0  ;;  %v3950_v62 = vand.u32 4294901760, %v3147_v36  ;;  %v3195_v11 = vsub.f32 %v291_v29, %v3174_v24  ;;  %v3951_v18 = vand.u32 4294901760, %v3155_v16 }
  0x38   : > { %2477 = vmatprep.mubr.f32.mxu0 %v527_v38  ;;  %v202_v38 = vld [vmem:[%s2884_s26 + $0xe0] sm:$0xff]  ;;  %v3197_v42 = vand.u32 4294901760, %v294_v28  ;;  %v567_v10 = vand.u32 4294901760, %v566_v58  ;;  %v3952_v29 = vand.u32 4294901760, %v3161_v17 }
  0x39   : > { %v576_v55 = vsub.f32 %v3147_v36, %v3950_v62  ;;  %v303_v22 = vsel %vm217_vm0, %v202_v38, 0 }
  0x3a   : > { %2534 = vmatmul.mubr.f32.gmra.mxu1 %v3069_v59  ;;  %v586_v59 = vsub.f32 %v3155_v16, %v3951_v18  ;;  %v596_v62 = vsub.f32 %v3161_v17, %v3952_v29  ;;  %v306_v18 = vsel %vm217_vm0, %v203_v46, 0 }
  0x3b   : > { %2478 = vmatmul.mubr.f32.gmra.mxu0 %v537_v50  ;;  %2536 = vmatprep.mubr.f32.mxu1 %v3085_v0  ;;  %v3202_v50 = vand.u32 4294901760, %v297_v47  ;;  %v300_v0 = vsel %vm217_vm0, %v201_v57, 0  ;;  %v577_v57 = vand.u32 4294901760, %v576_v55 }
  0x3c   : > { %2480 = vmatprep.mubr.f32.mxu0 %v547_v21  ;;  %v3953_v21 = vand.u32 4294901760, %v3164_v25  ;;  %v3221_v40 = vand.u32 4294901760, %v300_v0  ;;  %v587_v29 = vand.u32 4294901760, %v586_v59  ;;  %v597_v55 = vand.u32 4294901760, %v596_v62 }
  0x3d   : > { %v3224_v35 = vsub.f32 %v297_v47, %v3202_v50  ;;  %v3955_v59 = vand.u32 4294901760, %v3195_v11  ;;  %v3243_v47 = vand.u32 4294901760, %v306_v18 }
  0x3e   : > { %2537 = vmatmul.mubr.f32.gmra.mxu1 %v3099_v52  ;;  %v606_v58 = vsub.f32 %v3164_v25, %v3953_v21  ;;  %v3219_v52 = vsub.f32 %v294_v28, %v3197_v42  ;;  %v3226_v21 = vand.u32 4294901760, %v303_v22  ;;  %v3954_v28 = vand.u32 4294901760, %v3187_v63 }
  0x3f   : > { %2481 = vmatmul.mubr.f32.gmra.mxu0 %v557_v51  ;;  %2539 = vmatprep.mubr.f32.mxu1 %v3104_v8  ;;  %v309_v51 = vsel %vm217_vm0, %v204_v45, 0  ;;  %v205_v8 = vld [vmem:[%s2884_s26 + $0xf8] sm:$0xff]  ;;  %v3241_v45 = vsub.f32 %v300_v0, %v3221_v40  ;;  %v3259_v62 = vsub.f32 %v306_v18, %v3243_v47 }
  0x40   : > { %2483 = vmatprep.mubr.f32.mxu0 %v567_v10  ;;  %v607_v38 = vand.u32 4294901760, %v606_v58  ;;  %v616_v34 = vsub.f32 %v3187_v63, %v3954_v28  ;;  %v626_v10 = vsub.f32 %v3195_v11, %v3955_v59  ;;  %v3924_v46 = vand.u32 4294901760, %v3219_v52 }
  0x41   : > { %v3247_v58 = vsub.f32 %v303_v22, %v3226_v21  ;;  %v312_v28 = vsel %vm217_vm0, %v205_v8, 0  ;;  %v3956_v8 = vand.u32 4294901760, %v3224_v35 }
  0x42   : > { %2540 = vmatmul.mubr.f32.gmra.mxu1 %v3122_v31  ;;  %v617_v59 = vand.u32 4294901760, %v616_v34  ;;  %v636_v0 = vsub.f32 %v3219_v52, %v3924_v46  ;;  %v3261_v22 = vand.u32 4294901760, %v312_v28 }
  0x43   : > { %2484 = vmatmul.mubr.f32.gmra.mxu0 %v577_v57  ;;  %2542 = vmatprep.mubr.f32.mxu1 %v3130_v9  ;;  %v3249_v57 = vand.u32 4294901760, %v309_v51  ;;  %v627_v9 = vand.u32 4294901760, %v626_v10  ;;  %v646_v34 = vsub.f32 %v3224_v35, %v3956_v8  ;;  %v3926_v10 = vand.u32 4294901760, %v3259_v62 }
  0x44   : > { %2486 = vmatprep.mubr.f32.mxu0 %v587_v29  ;;  %v3925_v29 = vand.u32 4294901760, %v3241_v45  ;;  %v637_v18 = vand.u32 4294901760, %v636_v0  ;;  %v3277_v46 = vsub.f32 %v312_v28, %v3261_v22 }
  0x45   : > { %v647_v8 = vand.u32 4294901760, %v646_v34 }
  0x46   : > { %2543 = vmatmul.mubr.f32.gmra.mxu1 %v3137_v61  ;;  %v695_v28 = vand.u32 4294901760, %v3277_v46 }
  0x47   : > { %2487 = vmatmul.mubr.f32.gmra.mxu0 %v597_v55  ;;  %2545 = vmatprep.mubr.f32.mxu1 %v3139_v33  ;;  %v665_v55 = vand.u32 4294901760, %v3247_v58  ;;  %v3268_v33 = vsub.f32 %v309_v51, %v3249_v57 }
  0x48   : > { %2489 = vmatprep.mubr.f32.mxu0 %v607_v38  ;;  %v656_v38 = vsub.f32 %v3241_v45, %v3925_v29  ;;  %v676_v29 = vsub.f32 %v3259_v62, %v3926_v10 }
  0x49   : > { %v666_v51 = vsub.f32 %v3247_v58, %v665_v55 }
  0x4a   : > { %2546 = vmatmul.mubr.f32.gmra.mxu1 %v3166_v37  ;;  %v657_v0 = vand.u32 4294901760, %v656_v38  ;;  %v696_v38 = vsub.f32 %v3277_v46, %v695_v28 }
  0x4b   : > { %2490 = vmatmul.mubr.f32.gmra.mxu0 %v617_v59  ;;  %2548 = vmatprep.mubr.f32.mxu1 %v3174_v24  ;;  %v685_v59 = vand.u32 4294901760, %v3268_v33 }
  0x4c   : > { %2492 = vmatprep.mubr.f32.mxu0 %v627_v9  ;;  %v667_v9 = vand.u32 4294901760, %v666_v51  ;;  %v3957_v51 = vand.u32 4294901760, %v2917_v39 }
  0x4d   : > { %v686_v34 = vsub.f32 %v3268_v33, %v685_v59 }
  0x4e   : > { %2549 = vmatmul.mubr.f32.gmra.mxu1 %v3197_v42 }
  0x4f   : > { %2493 = vmatmul.mubr.f32.gmra.mxu0 %v637_v18  ;;  %2551 = vmatprep.mubr.f32.mxu1 %v3202_v50  ;;  %v677_v18 = vand.u32 4294901760, %v676_v29  ;;  %v687_v10 = vand.u32 4294901760, %v686_v34  ;;  %v3958_v29 = vand.u32 4294901760, %v2926_v43 }
  0x50   : > { %2495 = vmatprep.mubr.f32.mxu0 %v647_v8  ;;  %v697_v8 = vand.u32 4294901760, %v696_v38 }
  0x52   : > { %2552 = vmatmul.mubr.f32.gmra.mxu1 %v3221_v40 }
  0x53   : > { %2496 = vmatmul.mubr.f32.gmra.mxu0 %v657_v0  ;;  %2554 = vmatprep.mubr.f32.mxu1 %v3226_v21  ;;  %v3960_v0 = vand.u32 4294901760, %v2937_v48 }
  0x54   : > { %2498 = vmatprep.mubr.f32.mxu0 %v667_v9  ;;  %v4005_v9 = vld [vmem:[#allocation21_spill] sm:$0xff] }
  0x56   : > { %2555 = vmatmul.mubr.f32.gmra.mxu1 %v3243_v47 }
  0x57   : > { %2499 = vmatmul.mubr.f32.gmra.mxu0 %v677_v18  ;;  %2557 = vmatprep.mubr.f32.mxu1 %v3249_v57 }
  0x58   : > { %2501 = vmatprep.mubr.f32.mxu0 %v687_v10  ;;  %v3959_v10 = vand.u32 4294901760, %v2929_v44 }
  0x5a   : > { %2558 = vmatmul.mubr.f32.gmra.mxu1 %v3261_v22 }
  0x5b   : > { %2502 = vmatmul.mubr.f32.gmra.mxu0 %v697_v8  ;;  %2624 = vmatprep.mubr.f32.mxu1 %v3957_v51 }
  0x5c   : > { %2568 = vmatprep.mubr.f32.mxu0 %v2917_v39  ;;  %v3961_v39 = vand.u32 4294901760, %v2944_v53 }
  0x5e   : > { %2625 = vmatmul.mubr.f32.vlgmr.msra.gmra.mxu1 %v3958_v29 }
  0x5f   : > { %2569 = vmatmul.mubr.f32.vlgmr.msra.gmra.mxu0 %v2926_v43  ;;  %2729 = vmatpush3.msra.mxu1 %v2837_v3  ;;  %v3962_v3 = vand.u32 4294901760, %v2947_v54  ;;  %v3969_v43 = vand.u32 4294901760, %v3044_v27 }
  0x60   : > { %2673 = vmatpush3.msra.mxu0 %v2865_v12  ;;  %2571 = vmatprep.mubr.f32.mxu0 %v2929_v44  ;;  %v3963_v12 = vand.u32 4294901760, %v2970_v2  ;;  %v3971_v44 = vand.u32 4294901760, %v3062_v49 }
  0x61   : > { %2627 = vmatprep.mubr.f32.mxu1 %v3959_v10  ;;  %2674 = vmatprep.subr.mxu0 %v2869_v13 }
  0x62   : > { %2628 = vmatmul.mubr.f32.gmra.mxu1 %v3960_v0  ;;  %2675 = vmatpush3.msra.mxu0 %v2869_v13  ;;  %v3965_v13 = vand.u32 4294901760, %v3004_v41 }
  0x63   : > { %2572 = vmatmul.mubr.f32.gmra.mxu0 %v2937_v48  ;;  %2630 = vmatprep.mubr.f32.mxu1 %v3961_v39  ;;  %v3972_v48 = vand.u32 4294901760, %v3083_v19 }
  0x64   : > { %2574 = vmatprep.mubr.f32.mxu0 %v2944_v53  ;;  %2730 = vmatprep.subr.mxu1 %v2839_v4  ;;  %v3973_v53 = vand.u32 4294901760, %v3097_v56 }
  0x65   : > { %2731 = vmatpush3.msra.mxu1 %v2839_v4  ;;  %2676 = vmatprep.subr.mxu0 %v2872_v14  ;;  %v3964_v4 = vand.u32 4294901760, %v2973_v6 }
  0x66   : > { %2631 = vmatmul.mubr.f32.gmra.mxu1 %v3962_v3  ;;  %2677 = vmatpush3.msra.mxu0 %v2872_v14  ;;  %v3967_v14 = vand.u32 4294901760, %v3024_v1 }
  0x67   : > { %2575 = vmatmul.mubr.f32.gmra.mxu0 %v2947_v54  ;;  %2633 = vmatprep.mubr.f32.mxu1 %v3963_v12  ;;  %v3974_v54 = vand.u32 4294901760, %v3120_v23 }
  0x68   : > { %2577 = vmatprep.mubr.f32.mxu0 %v2970_v2  ;;  %2732 = vmatprep.subr.mxu1 %v2841_v5  ;;  %v3975_v2 = vand.u32 4294901760, %v3128_v26 }
  0x69   : > { %2733 = vmatpush3.msra.mxu1 %v2841_v5  ;;  %2678 = vmatprep.subr.mxu0 %v2877_v15  ;;  %v3966_v5 = vand.u32 4294901760, %v3017_v60 }
  0x6a   : > { %2634 = vmatmul.mubr.f32.gmra.mxu1 %v3964_v4  ;;  %2679 = vmatpush3.msra.mxu0 %v2877_v15  ;;  %v3968_v15 = vand.u32 4294901760, %v3033_v20 }
  0x6b   : > { %2578 = vmatmul.mubr.f32.gmra.mxu0 %v2973_v6  ;;  %2636 = vmatprep.mubr.f32.mxu1 %v3965_v13  ;;  %v3976_v6 = vand.u32 4294901760, %v3147_v36 }
  0x6c   : > { %2580 = vmatprep.mubr.f32.mxu0 %v3004_v41  ;;  %2734 = vmatprep.subr.mxu1 %v2846_v7  ;;  %v3977_v41 = vand.u32 4294901760, %v3155_v16 }
  0x6d   : > { %2735 = vmatpush3.msra.mxu1 %v2846_v7  ;;  %v3970_v7 = vand.u32 4294901760, %v3052_v30 }
  0x6e   : > { %2637 = vmatmul.mubr.f32.gmra.mxu1 %v3966_v5 }
  0x6f   : > { %2581 = vmatmul.mubr.f32.gmra.mxu0 %v3017_v60  ;;  %2639 = vmatprep.mubr.f32.mxu1 %v3967_v14  ;;  %v3979_v60 = vand.u32 4294901760, %v3164_v25 }
  0x70   : > { %2583 = vmatprep.mubr.f32.mxu0 %v3024_v1  ;;  %v3980_v1 = vand.u32 4294901760, %v3187_v63 }
  0x72   : > { %2640 = vmatmul.mubr.f32.gmra.mxu1 %v3968_v15 }
  0x73   : > { %2584 = vmatmul.mubr.f32.gmra.mxu0 %v3033_v20  ;;  %2642 = vmatprep.mubr.f32.mxu1 %v3969_v43  ;;  %v3984_v20 = vand.u32 4294901760, %v3241_v45 }
  0x74   : > { %2586 = vmatprep.mubr.f32.mxu0 %v3044_v27  ;;  %v3988_v27 = vld [vmem:[#allocation4_spill] sm:$0xff] }
  0x76   : > { %2643 = vmatmul.mubr.f32.gmra.mxu1 %v3970_v7 }
  0x77   : > { %2587 = vmatmul.mubr.f32.gmra.mxu0 %v3052_v30  ;;  %2645 = vmatprep.mubr.f32.mxu1 %v3971_v44  ;;  %v3989_v30 = vld [vmem:[#allocation5_spill] sm:$0xff] }
  0x78   : > { %2589 = vmatprep.mubr.f32.mxu0 %v3062_v49  ;;  %v3990_v49 = vld [vmem:[#allocation6_spill] sm:$0xff] }
  0x7a   : > { %2646 = vmatmul.mubr.f32.gmra.mxu1 %v3972_v48 }
  0x7b   : > { %2590 = vmatmul.mubr.f32.gmra.mxu0 %v3083_v19  ;;  %2648 = vmatprep.mubr.f32.mxu1 %v3973_v53  ;;  %v3983_v19 = vand.u32 4294901760, %v3224_v35 }
  0x7c   : > { %2592 = vmatprep.mubr.f32.mxu0 %v3097_v56  ;;  %v3978_v56 = vand.u32 4294901760, %v3161_v17 }
  0x7e   : > { %2649 = vmatmul.mubr.f32.gmra.mxu1 %v3974_v54 }
  0x7f   : > { %2593 = vmatmul.mubr.f32.gmra.mxu0 %v3120_v23  ;;  %2651 = vmatprep.mubr.f32.mxu1 %v3975_v2  ;;  %v3992_v23 = vld [vmem:[#allocation8_spill] sm:$0xff] }
  0x80   : > { %2595 = vmatprep.mubr.f32.mxu0 %v3128_v26  ;;  %v3985_v26 = vand.u32 4294901760, %v3259_v62 }
  0x82   : > { %2652 = vmatmul.mubr.f32.gmra.mxu1 %v3976_v6 }
  0x83   : > { %2596 = vmatmul.mubr.f32.gmra.mxu0 %v3147_v36  ;;  %2654 = vmatprep.mubr.f32.mxu1 %v3977_v41  ;;  %v3981_v36 = vand.u32 4294901760, %v3195_v11 }
  0x84   : > { %2598 = vmatprep.mubr.f32.mxu0 %v3155_v16  ;;  %v3982_v16 = vand.u32 4294901760, %v3219_v52 }
  0x86   : > { %2655 = vmatmul.mubr.f32.gmra.mxu1 %v3978_v56 }
  0x87   : > { %2599 = vmatmul.mubr.f32.gmra.mxu0 %v3161_v17  ;;  %2657 = vmatprep.mubr.f32.mxu1 %v3979_v60  ;;  %v3994_v17 = vld [vmem:[#allocation10_spill] sm:$0xff] }
  0x88   : > { %2601 = vmatprep.mubr.f32.mxu0 %v3164_v25  ;;  %v3995_v25 = vld [vmem:[#allocation11_spill] sm:$0xff] }
  0x8a   : > { %2658 = vmatmul.mubr.f32.gmra.mxu1 %v3980_v1 }
  0x8b   : > { %2602 = vmatmul.mubr.f32.gmra.mxu0 %v3187_v63  ;;  %2660 = vmatprep.mubr.f32.mxu1 %v3981_v36  ;;  %v3997_v63 = vld [vmem:[#allocation13_spill] sm:$0xff] }
  0x8c   : > { %2604 = vmatprep.mubr.f32.mxu0 %v3195_v11  ;;  %v3996_v11 = vld [vmem:[#allocation12_spill] sm:$0xff] }
  0x8e   : > { %2661 = vmatmul.mubr.f32.gmra.mxu1 %v3982_v16 }
  0x8f   : > { %2605 = vmatmul.mubr.f32.gmra.mxu0 %v3219_v52  ;;  %2663 = vmatprep.mubr.f32.mxu1 %v3983_v19  ;;  %v3987_v52 = vld [vmem:[#allocation3_spill] sm:$0xff] }
  0x90   : > { %2607 = vmatprep.mubr.f32.mxu0 %v3224_v35  ;;  %v3986_v35 = vld [vmem:[#allocation2_spill] sm:$0xff] }
  0x92   : > { %2664 = vmatmul.mubr.f32.gmra.mxu1 %v3984_v20 }
  0x93   : > { %2608 = vmatmul.mubr.f32.gmra.mxu0 %v3241_v45  ;;  %2666 = vmatprep.mubr.f32.mxu1 %v665_v55  ;;  %v3999_v45 = vld [vmem:[#allocation15_spill] sm:$0xff]  ;;  %v4002_v55 = vld [vmem:[#allocation18_spill] sm:$0xff] }
  0x94   : > { %2610 = vmatprep.mubr.f32.mxu0 %v3247_v58  ;;  %v4001_v58 = vld [vmem:[#allocation17_spill] sm:$0xff] }
  0x96   : > { %2667 = vmatmul.mubr.f32.gmra.mxu1 %v3985_v26 }
  0x97   : > { %2611 = vmatmul.mubr.f32.gmra.mxu0 %v3259_v62  ;;  %2669 = vmatprep.mubr.f32.mxu1 %v685_v59  ;;  %v4000_v62 = vld [vmem:[#allocation16_spill] sm:$0xff]  ;;  %v4003_v59 = vld [vmem:[#allocation19_spill] sm:$0xff] }
  0x98   : > { %2613 = vmatprep.mubr.f32.mxu0 %v3268_v33  ;;  %v3993_v33 = vld [vmem:[#allocation9_spill] sm:$0xff] }
  0x9a   : > { %2670 = vmatmul.mubr.f32.gmra.mxu1 %v695_v28  ;;  %v4004_v28 = vld [vmem:[#allocation20_spill] sm:$0xff] }
  0x9b   : > { %2614 = vmatmul.mubr.f32.gmra.mxu0 %v3277_v46  ;;  %2736 = vmatprep.mubr.f32.mxu1 %v2906_v32  ;;  %v3998_v46 = vld [vmem:[#allocation14_spill] sm:$0xff] }
  0x9c   : > { %2680 = vmatprep.mubr.f32.mxu0 %v2906_v32  ;;  %v3991_v32 = vld [vmem:[#allocation7_spill] sm:$0xff] }
  0x9e   : > { %2737 = vmatmul.mubr.f32.vlgmr.msra.gmra.mxu1 %v3986_v35 }
  0x9f   : > { %2681 = vmatmul.mubr.f32.vlgmr.msra.gmra.mxu0 %v3986_v35  ;;  %2739 = vmatprep.mubr.f32.mxu1 %v3987_v52 }
  0xa0   : > { %2683 = vmatprep.mubr.f32.mxu0 %v3987_v52 }
  0xa2   : > { %2740 = vmatmul.mubr.f32.gmra.mxu1 %v3988_v27 }
  0xa3   : > { %2684 = vmatmul.mubr.f32.gmra.mxu0 %v3988_v27  ;;  %2742 = vmatprep.mubr.f32.mxu1 %v3989_v30 }
  0xa4   : > { %2686 = vmatprep.mubr.f32.mxu0 %v3989_v30 }
  0xa6   : > { %2743 = vmatmul.mubr.f32.gmra.mxu1 %v3990_v49 }
  0xa7   : > { %2687 = vmatmul.mubr.f32.gmra.mxu0 %v3990_v49  ;;  %2745 = vmatprep.mubr.f32.mxu1 %v3991_v32 }
  0xa8   : > { %2689 = vmatprep.mubr.f32.mxu0 %v3991_v32 }
  0xaa   : > { %2746 = vmatmul.mubr.f32.gmra.mxu1 %v3992_v23 }
  0xab   : > { %2690 = vmatmul.mubr.f32.gmra.mxu0 %v3992_v23  ;;  %2748 = vmatprep.mubr.f32.mxu1 %v3993_v33 }
  0xac   : > { %2692 = vmatprep.mubr.f32.mxu0 %v3993_v33 }
  0xae   : > { %2749 = vmatmul.mubr.f32.gmra.mxu1 %v3994_v17 }
  0xaf   : > { %2693 = vmatmul.mubr.f32.gmra.mxu0 %v3994_v17  ;;  %2751 = vmatprep.mubr.f32.mxu1 %v3995_v25 }
  0xb0   : > { %2695 = vmatprep.mubr.f32.mxu0 %v3995_v25 }
  0xb2   : > { %2752 = vmatmul.mubr.f32.gmra.mxu1 %v3996_v11 }
  0xb3   : > { %2696 = vmatmul.mubr.f32.gmra.mxu0 %v3996_v11  ;;  %2754 = vmatprep.mubr.f32.mxu1 %v3997_v63 }
  0xb4   : > { %2698 = vmatprep.mubr.f32.mxu0 %v3997_v63 }
  0xb6   : > { %2755 = vmatmul.mubr.f32.gmra.mxu1 %v3998_v46 }
  0xb7   : > { %2699 = vmatmul.mubr.f32.gmra.mxu0 %v3998_v46  ;;  %2757 = vmatprep.mubr.f32.mxu1 %v3999_v45 }
  0xb8   : > { %2701 = vmatprep.mubr.f32.mxu0 %v3999_v45 }
  0xba   : > { %2758 = vmatmul.mubr.f32.gmra.mxu1 %v4000_v62 }
  0xbb   : > { %2702 = vmatmul.mubr.f32.gmra.mxu0 %v4000_v62  ;;  %2760 = vmatprep.mubr.f32.mxu1 %v4001_v58 }
  0xbc   : > { %2704 = vmatprep.mubr.f32.mxu0 %v4001_v58 }
  0xbe   : > { %2761 = vmatmul.mubr.f32.gmra.mxu1 %v4002_v55 }
  0xbf   : > { %2705 = vmatmul.mubr.f32.gmra.mxu0 %v4002_v55  ;;  %2763 = vmatprep.mubr.f32.mxu1 %v4003_v59 }
  0xc0   : > { %2707 = vmatprep.mubr.f32.mxu0 %v4003_v59 }
  0xc2   : > { %2764 = vmatmul.mubr.f32.gmra.mxu1 %v3122_v31 }
  0xc3   : > { %2708 = vmatmul.mubr.f32.gmra.mxu0 %v3122_v31  ;;  %2766 = vmatprep.mubr.f32.mxu1 %v4004_v28 }
  0xc4   : > { %2710 = vmatprep.mubr.f32.mxu0 %v4004_v28 }
  0xc6   : > { %2767 = vmatmul.mubr.f32.gmra.mxu1 %v3137_v61 }
  0xc7   : > { %2711 = vmatmul.mubr.f32.gmra.mxu0 %v3137_v61  ;;  %2769 = vmatprep.mubr.f32.mxu1 %v4005_v9 }
  0xc8   : > { %2713 = vmatprep.mubr.f32.mxu0 %v4005_v9 }
  0xca   : > { %2770 = vmatmul.mubr.f32.gmra.mxu1 %v3166_v37 }
  0xcb   : > { %2714 = vmatmul.mubr.f32.gmra.mxu0 %v3166_v37  ;;  %2772 = vmatprep.mubr.f32.mxu1 %v3174_v24 }
  0xcc   : > { %2716 = vmatprep.mubr.f32.mxu0 %v3174_v24 }
  0xce   : > { %2773 = vmatmul.mubr.f32.gmra.mxu1 %v3197_v42 }
  0xcf   : > { %2717 = vmatmul.mubr.f32.gmra.mxu0 %v3197_v42  ;;  %2775 = vmatprep.mubr.f32.mxu1 %v3202_v50 }
  0xd0   : > { %2719 = vmatprep.mubr.f32.mxu0 %v3202_v50 }
  0xd2   : > { %2776 = vmatmul.mubr.f32.gmra.mxu1 %v3221_v40 }
  0xd3   : > { %2720 = vmatmul.mubr.f32.gmra.mxu0 %v3221_v40  ;;  %2778 = vmatprep.mubr.f32.mxu1 %v3226_v21  ;;  %v3477_v40 = vld [vmem:[%s3866_s2] ss:$0 sm:$0xff] }
  0xd4   : > { %2722 = vmatprep.mubr.f32.mxu0 %v3226_v21 }
  0xd6   : > { %2779 = vmatmul.mubr.f32.gmra.mxu1 %v3243_v47 }
  0xd7   : > { %2723 = vmatmul.mubr.f32.gmra.mxu0 %v3243_v47  ;;  %2781 = vmatprep.mubr.f32.mxu1 %v3249_v57 }
  0xd8   : > { %2725 = vmatprep.mubr.f32.mxu0 %v3249_v57 }
  0xda   : > { %2782 = vmatmul.mubr.f32.gmra.mxu1 %v3261_v22 }
  0xdb   : > { %2726 = vmatmul.mubr.f32.gmra.mxu0 %v3261_v22 }
  0xde   : > { %v2514_v42 = vpop.f32.mrf.mxu1 }
  0xdf   : > { %v2458_v31 = vpop.f32.mrf.mxu0 }
  0xe0   : > { %v400_v61 = vadd.f32 %v2458_v31, %v3477_v40  ;;  %v790_v37 = vpop.f32.mrf.mxu1 }
  0xe1   : > { %v389_v24 = vpop.f32.mrf.mxu0 }
  0xe2   : > { %v3480_v50 = vadd.f32 %v2514_v42, %v400_v61  ;;  %v390_v21 = vadd.f32 %v3477_v40, %v389_v24  ;;  %v2517_v47 = vpop.f32.mrf.mxu1 }
  0xe3   : > { %v2461_v57 = vpop.f32.mrf.mxu0 }
  0xe4   : > { %v3483_v34 = vadd.f32 %v790_v37, %v390_v21  ;;  %v420_v22 = vadd.f32 %v2461_v57, %v3477_v40  ;;  %v802_v18 = vpop.f32.mrf.mxu1 }
  0xe5   : > { %v409_v38 = vpop.f32.mrf.mxu0 }
  0xe6   : > { %v3486_v8 = vadd.f32 %v2517_v47, %v420_v22  ;;  %v410_v51 = vadd.f32 %v3477_v40, %v409_v38  ;;  %v2520_v29 = vpop.f32.mrf.mxu1 }
  0xe7   : > { %v2464_v10 = vpop.f32.mrf.mxu0 }
  0xe8   : > { %v3489_v0 = vadd.f32 %v802_v18, %v410_v51  ;;  %v440_v39 = vadd.f32 %v2464_v10, %v3477_v40  ;;  %v814_v3 = vpop.f32.mrf.mxu1 }
  0xe9   : > { %v429_v12 = vpop.f32.mrf.mxu0 }
  0xea   : > { %v3492_v4 = vadd.f32 %v2520_v29, %v440_v39  ;;  %v430_v13 = vadd.f32 %v3477_v40, %v429_v12  ;;  %v2523_v5 = vpop.f32.mrf.mxu1 }
  0xeb   : > { %v2467_v14 = vpop.f32.mrf.mxu0 }
  0xec   : > { %v3495_v15 = vadd.f32 %v814_v3, %v430_v13  ;;  %v460_v43 = vadd.f32 %v2467_v14, %v3477_v40  ;;  %v826_v7 = vpop.f32.mrf.mxu1 }
  0xed   : > { %v449_v44 = vpop.f32.mrf.mxu0 }
  0xee   : > { %v3498_v48 = vadd.f32 %v2523_v5, %v460_v43  ;;  %v450_v53 = vadd.f32 %v3477_v40, %v449_v44  ;;  %v2526_v54 = vpop.f32.mrf.mxu1 }
  0xef   : > { %v2470_v2 = vpop.f32.mrf.mxu0 }
  0xf0   : > { %v3501_v6 = vadd.f32 %v826_v7, %v450_v53  ;;  %v480_v41 = vadd.f32 %v2470_v2, %v3477_v40  ;;  %v838_v56 = vpop.f32.mrf.mxu1 }
  0xf1   : > { %v469_v60 = vpop.f32.mrf.mxu0 }
  0xf2   : > { %v3504_v1 = vadd.f32 %v2526_v54, %v480_v41  ;;  %v470_v36 = vadd.f32 %v3477_v40, %v469_v60  ;;  %v2529_v16 = vpop.f32.mrf.mxu1 }
  0xf3   : > { %v2473_v19 = vpop.f32.mrf.mxu0 }
  0xf4   : > { %v3507_v20 = vadd.f32 %v838_v56, %v470_v36  ;;  %v500_v26 = vadd.f32 %v2473_v19, %v3477_v40  ;;  %v850_v35 = vpop.f32.mrf.mxu1 }
  0xf5   : > { %v489_v52 = vpop.f32.mrf.mxu0 }
  0xf6   : > { %v3510_v27 = vadd.f32 %v2529_v16, %v500_v26  ;;  %v490_v30 = vadd.f32 %v3477_v40, %v489_v52  ;;  %v2532_v49 = vpop.f32.mrf.mxu1 }
  0xf7   : > { %v2476_v32 = vpop.f32.mrf.mxu0 }
  0xf8   : > { %v3513_v23 = vadd.f32 %v850_v35, %v490_v30  ;;  %v520_v33 = vadd.f32 %v2476_v32, %v3477_v40  ;;  %v862_v17 = vpop.f32.mrf.mxu1 }
  0xf9   : > { %v509_v25 = vpop.f32.mrf.mxu0 }
  0xfa   : > { %v3516_v11 = vadd.f32 %v2532_v49, %v520_v33  ;;  %v510_v63 = vadd.f32 %v3477_v40, %v509_v25  ;;  %v2535_v46 = vpop.f32.mrf.mxu1 }
  0xfb   : > { %v2479_v45 = vpop.f32.mrf.mxu0 }
  0xfc   : > { %v3519_v62 = vadd.f32 %v862_v17, %v510_v63  ;;  %v540_v58 = vadd.f32 %v2479_v45, %v3477_v40  ;;  %v874_v55 = vpop.f32.mrf.mxu1 }
  0xfd   : > { %v529_v59 = vpop.f32.mrf.mxu0 }
  0xfe   : > { %v3522_v28 = vadd.f32 %v2535_v46, %v540_v58  ;;  %v530_v9 = vadd.f32 %v3477_v40, %v529_v59  ;;  %v2538_v42 = vpop.f32.mrf.mxu1 }
  0xff   : > { %v2482_v31 = vpop.f32.mrf.mxu0 }
 0x100   : > { %v3525_v61 = vadd.f32 %v874_v55, %v530_v9  ;;  %v560_v37 = vadd.f32 %v2482_v31, %v3477_v40  ;;  %v886_v24 = vpop.f32.mrf.mxu1 }
 0x101   : > { %v549_v21 = vpop.f32.mrf.mxu0 }
 0x102   : > { %v3528_v47 = vadd.f32 %v2538_v42, %v560_v37  ;;  %v550_v57 = vadd.f32 %v3477_v40, %v549_v21  ;;  %v2541_v22 = vpop.f32.mrf.mxu1 }
 0x103   : > { %v2485_v18 = vpop.f32.mrf.mxu0 }
 0x104   : > { %v3531_v38 = vadd.f32 %v886_v24, %v550_v57  ;;  %v580_v51 = vadd.f32 %v2485_v18, %v3477_v40  ;;  %v898_v29 = vpop.f32.mrf.mxu1 }
 0x105   : > { %v569_v10 = vpop.f32.mrf.mxu0 }
 0x106   : > { %v3534_v39 = vadd.f32 %v2541_v22, %v580_v51  ;;  %v570_v3 = vadd.f32 %v3477_v40, %v569_v10  ;;  %v2544_v12 = vpop.f32.mrf.mxu1 }
 0x107   : > { %v2488_v13 = vpop.f32.mrf.mxu0 }
 0x108   : > { %4006 = vst [vmem:[#allocation2_spill] sm:$0xff] %v3534_v39  ;;  %v3537_v5 = vadd.f32 %v898_v29, %v570_v3  ;;  %v600_v14 = vadd.f32 %v2488_v13, %v3477_v40  ;;  %v910_v43 = vpop.f32.mrf.mxu1 }
 0x109   : > { %v589_v7 = vpop.f32.mrf.mxu0 }
 0x10a   : > { %4007 = vst [vmem:[#allocation3_spill] sm:$0xff] %v3537_v5  ;;  %v3540_v44 = vadd.f32 %v2544_v12, %v600_v14  ;;  %v590_v53 = vadd.f32 %v3477_v40, %v589_v7  ;;  %v2547_v54 = vpop.f32.mrf.mxu1 }
 0x10b   : > { %v2491_v2 = vpop.f32.mrf.mxu0 }
 0x10c   : > { %4008 = vst [vmem:[#allocation4_spill] sm:$0xff] %v3540_v44  ;;  %v3543_v41 = vadd.f32 %v910_v43, %v590_v53  ;;  %v620_v56 = vadd.f32 %v2491_v2, %v3477_v40  ;;  %v922_v60 = vpop.f32.mrf.mxu1 }
 0x10d   : > { %v609_v36 = vpop.f32.mrf.mxu0 }
 0x10e   : > { %4009 = vst [vmem:[#allocation5_spill] sm:$0xff] %v3543_v41  ;;  %v3546_v16 = vadd.f32 %v2547_v54, %v620_v56  ;;  %v610_v19 = vadd.f32 %v3477_v40, %v609_v36  ;;  %v2550_v26 = vpop.f32.mrf.mxu1 }
 0x10f   : > { %v2494_v35 = vpop.f32.mrf.mxu0 }
 0x110   : > { %4010 = vst [vmem:[#allocation6_spill] sm:$0xff] %v3546_v16  ;;  %v3549_v52 = vadd.f32 %v922_v60, %v610_v19  ;;  %v640_v30 = vadd.f32 %v2494_v35, %v3477_v40  ;;  %v934_v49 = vpop.f32.mrf.mxu1 }
 0x111   : > { %v629_v32 = vpop.f32.mrf.mxu0 }
 0x112   : > { %4011 = vst [vmem:[#allocation7_spill] sm:$0xff] %v3549_v52  ;;  %v3552_v33 = vadd.f32 %v2550_v26, %v640_v30  ;;  %v630_v17 = vadd.f32 %v3477_v40, %v629_v32  ;;  %v2553_v25 = vpop.f32.mrf.mxu1 }
 0x113   : > { %v2497_v63 = vpop.f32.mrf.mxu0 }
 0x114   : > { %4012 = vst [vmem:[#allocation8_spill] sm:$0xff] %v3552_v33  ;;  %v3555_v46 = vadd.f32 %v934_v49, %v630_v17  ;;  %v660_v45 = vadd.f32 %v2497_v63, %v3477_v40  ;;  %v946_v58 = vpop.f32.mrf.mxu1 }
 0x115   : > { %v649_v55 = vpop.f32.mrf.mxu0 }
 0x116   : > { %4013 = vst [vmem:[#allocation9_spill] sm:$0xff] %v3555_v46  ;;  %v3558_v59 = vadd.f32 %v2553_v25, %v660_v45  ;;  %v650_v9 = vadd.f32 %v3477_v40, %v649_v55  ;;  %v2556_v42 = vpop.f32.mrf.mxu1 }
 0x117   : > { %v2500_v31 = vpop.f32.mrf.mxu0 }
 0x118   : > { %4014 = vst [vmem:[#allocation10_spill] sm:$0xff] %v3558_v59  ;;  %v3561_v37 = vadd.f32 %v946_v58, %v650_v9  ;;  %v680_v24 = vadd.f32 %v2500_v31, %v3477_v40  ;;  %v958_v21 = vpop.f32.mrf.mxu1 }
 0x119   : > { %v669_v57 = vpop.f32.mrf.mxu0 }
 0x11a   : > { %4015 = vst [vmem:[#allocation11_spill] sm:$0xff] %v3561_v37  ;;  %v3564_v22 = vadd.f32 %v2556_v42, %v680_v24  ;;  %v670_v18 = vadd.f32 %v3477_v40, %v669_v57  ;;  %v2559_v51 = vpop.f32.mrf.mxu1 }
 0x11b   : > { %v2503_v29 = vpop.f32.mrf.mxu0 }
 0x11c   : > { %4016 = vst [vmem:[#allocation12_spill] sm:$0xff] %v3564_v22  ;;  %v3567_v10 = vadd.f32 %v958_v21, %v670_v18  ;;  %v700_v3 = vadd.f32 %v2503_v29, %v3477_v40  ;;  %v970_v12 = vpop.f32.mrf.mxu1 }
 0x11d   : > { %v689_v13 = vpop.f32.mrf.mxu0 }
 0x11e   : > { %4017 = vst [vmem:[#allocation13_spill] sm:$0xff] %v3567_v10  ;;  %v3570_v14 = vadd.f32 %v2559_v51, %v700_v3  ;;  %v690_v43 = vadd.f32 %v3477_v40, %v689_v13  ;;  %v3573_v7 = vpop.f32.mrf.mxu1 }
 0x11f   : > { %v2570_v53 = vpop.f32.mrf.mxu0 }
 0x120   : > { %4018 = vst [vmem:[#allocation14_spill] sm:$0xff] %v3570_v14  ;;  %v3575_v54 = vadd.f32 %v970_v12, %v690_v43  ;;  %v3577_v2 = vpop.f32.mrf.mxu1 }
 0x121   : > { %v1056_v56 = vpop.f32.mrf.mxu0 }
 0x122   : > { %4019 = vst [vmem:[#allocation15_spill] sm:$0xff] %v3575_v54  ;;  %v3579_v60 = vpop.f32.mrf.mxu1 }
 0x123   : > { %v2573_v36 = vpop.f32.mrf.mxu0 }
 0x124   : > { %v3581_v19 = vpop.f32.mrf.mxu1 }
 0x125   : > { %v3583_v26 = vpop.f32.mrf.mxu0 }
 0x126   : > { %v3585_v35 = vpop.f32.mrf.mxu1 }
 0x127   : > { %v3587_v30 = vpop.f32.mrf.mxu0 }
 0x128   : > { %v3589_v40 = vpop.f32.mrf.mxu1 }
 0x129   : > { %v3591_v49 = vpop.f32.mrf.mxu0 }
 0x12a   : > { %v3593_v32 = vpop.f32.mrf.mxu1 }
 0x12b   : > { %v3595_v17 = vpop.f32.mrf.mxu0 }
 0x12c   : > { %v3597_v25 = vpop.f32.mrf.mxu1 }
 0x12d   : > { %v3599_v63 = vpop.f32.mrf.mxu0 }
 0x12e   : > { %v3601_v45 = vpop.f32.mrf.mxu1 }
 0x12f   : > { %v3603_v58 = vpop.f32.mrf.mxu0 }
 0x130   : > { %v3605_v55 = vpop.f32.mrf.mxu1 }
 0x131   : > { %v3607_v9 = vpop.f32.mrf.mxu0 }
 0x132   : > { %v3609_v42 = vpop.f32.mrf.mxu1 }
 0x133   : > { %v3611_v31 = vpop.f32.mrf.mxu0 }
 0x134   : > { %v3613_v24 = vpop.f32.mrf.mxu1 }
 0x135   : > { %v3615_v21 = vpop.f32.mrf.mxu0 }
 0x136   : > { %v3617_v57 = vpop.f32.mrf.mxu1 }
 0x137   : > { %v3619_v18 = vpop.f32.mrf.mxu0 }
 0x138   : > { %v3621_v51 = vpop.f32.mrf.mxu1 }
 0x139   : > { %v3623_v29 = vpop.f32.mrf.mxu0 }
 0x13a   : > { %v3625_v3 = vpop.f32.mrf.mxu1 }
 0x13b   : > { %v3627_v12 = vpop.f32.mrf.mxu0 }
 0x13c   : > { %v3629_v13 = vpop.f32.mrf.mxu1 }
 0x13d   : > { %v3631_v43 = vpop.f32.mrf.mxu0 }
 0x13e   : > { %v3633_v54 = vpop.f32.mrf.mxu1 }
 0x13f   : > { %v3635_v14 = vpop.f32.mrf.mxu0 }
 0x140   : > { %v3637_v10 = vpop.f32.mrf.mxu1 }
 0x141   : > { %4020 = vst [vmem:[#allocation16_spill] sm:$0xff] %v3637_v10  ;;  %v3639_v22 = vpop.f32.mrf.mxu0 }
 0x142   : > { %v3641_v37 = vpop.f32.mrf.mxu1 }
 0x143   : > { %4021 = vst [vmem:[#allocation17_spill] sm:$0xff] %v3641_v37  ;;  %v3643_v59 = vpop.f32.mrf.mxu0 }
 0x144   : > { %4022 = vst [vmem:[#allocation18_spill] sm:$0xff] %v3643_v59  ;;  %v3645_v46 = vpop.f32.mrf.mxu1 }
 0x145   : > { %4023 = vst [vmem:[#allocation19_spill] sm:$0xff] %v3645_v46  ;;  %v3647_v33 = vpop.f32.mrf.mxu0 }
 0x146   : > { %4024 = vst [vmem:[#allocation20_spill] sm:$0xff] %v3647_v33  ;;  %v3649_v52 = vpop.f32.mrf.mxu1 }
 0x147   : > { %4025 = vst [vmem:[#allocation21_spill] sm:$0xff] %v3649_v52  ;;  %v3651_v16 = vpop.f32.mrf.mxu0 }
 0x148   : > { %4026 = vst [vmem:[#allocation22_spill] sm:$0xff] %v3651_v16  ;;  %v3653_v41 = vpop.f32.mrf.mxu1 }
 0x149   : > { %4027 = vst [vmem:[#allocation23_spill] sm:$0xff] %v3653_v41  ;;  %v3655_v44 = vpop.f32.mrf.mxu0 }
 0x14a   : > { %4028 = vst [vmem:[#allocation24_spill] sm:$0xff] %v3655_v44  ;;  %v3657_v5 = vpop.f32.mrf.mxu1 }
 0x14b   : > { %4029 = vst [vmem:[#allocation25_spill] sm:$0xff] %v3657_v5  ;;  %v3659_v10 = vpop.f32.mrf.mxu0 }
 0x14c   : > { %4030 = vst [vmem:[#allocation26_spill] sm:$0xff] %v3659_v10  ;;  %v3661_v39 = vpop.f32.mrf.mxu1 }
 0x14d   : > { %4031 = vst [vmem:[#allocation27_spill] sm:$0xff] %v3661_v39  ;;  %v3663_v37 = vpop.f32.mrf.mxu0 }
 0x14e   : > { %4032 = vst [vmem:[#allocation28_spill] sm:$0xff] %v3663_v37  ;;  %v3665_v59 = vpop.f32.mrf.mxu1 }
 0x14f   : > { %4033 = vst [vmem:[#allocation29_spill] sm:$0xff] %v3665_v59  ;;  %v3667_v46 = vpop.f32.mrf.mxu0 }
 0x150   : > { %4034 = vst [vmem:[#allocation30_spill] sm:$0xff] %v3667_v46  ;;  %v3669_v33 = vpop.f32.mrf.mxu1 }
 0x151   : > { %4035 = vst [vmem:[#allocation31_spill] sm:$0xff] %v3669_v33  ;;  %v3671_v52 = vpop.f32.mrf.mxu0  ;;  %v1064_v33 = vadd.f32 %v2570_v53, %v3480_v50  ;;  %v1071_v50 = vadd.f32 %v3583_v26, %v3489_v0 }
 0x152   : > { %4036 = vst [vmem:[#allocation32_spill] sm:$0xff] %v3671_v52  ;;  %v3673_v16 = vpop.f32.mrf.mxu1 }
 0x153   : > { %4037 = vst [vmem:[#allocation33_spill] sm:$0xff] %v3673_v16  ;;  %v3675_v41 = vpop.f32.mrf.mxu0 }
 0x154   : > { %4038 = vst [vmem:[#allocation34_spill] sm:$0xff] %v3675_v41  ;;  %v3677_v44 = vpop.f32.mrf.mxu1  ;;  %v1057_v41 = vadd.f32 %v1056_v56, %v3483_v34 }
 0x155   : > { %4039 = vst [vmem:[#allocation35_spill] sm:$0xff] %v3677_v44  ;;  %v3679_v5 = vpop.f32.mrf.mxu0 }
 0x156   : > { %4040 = vst [vmem:[#allocation36_spill] sm:$0xff] %v3679_v5  ;;  %v3681_v10 = vpop.f32.mrf.mxu1 }
 0x157   : > { %4041 = vst [vmem:[#allocation37_spill] sm:$0xff] %v3681_v10  ;;  %v3683_v39 = vpop.f32.mrf.mxu0  ;;  %v1359_v10 = vadd.f32 %v3573_v7, %v1064_v33  ;;  %v1092_v33 = vadd.f32 %v3587_v30, %v3492_v4  ;;  %v1106_v4 = vadd.f32 %v3595_v17, %v3498_v48 }
 0x158   : > { %4042 = vst [vmem:[#allocation38_spill] sm:$0xff] %v3683_v39  ;;  %v3685_v37 = vpop.f32.mrf.mxu1  ;;  %v1078_v39 = vadd.f32 %v2573_v36, %v3486_v8 }
 0x159   : > { %4043 = vst [vmem:[#allocation39_spill] sm:$0xff] %v3685_v37  ;;  %v3687_v59 = vpop.f32.mrf.mxu0  ;;  %v1407_v48 = vadd.f32 %v3593_v32, %v1106_v4 }
 0x15a   : > { %4044 = vst [vmem:[#allocation40_spill] sm:$0xff] %v3687_v59  ;;  %v3690_v52 = vpop.f32.mrf.mxu1  ;;  %v1351_v59 = vadd.f32 %v3577_v2, %v1057_v41  ;;  %v1375_v8 = vadd.f32 %v3579_v60, %v1078_v39  ;;  %v1391_v39 = vadd.f32 %v3585_v35, %v1092_v33 }
 0x15b   : > { %4045 = vst [vmem:[#allocation41_spill] sm:$0xff] %v3690_v52  ;;  %v3692_v16 = vpop.f32.mrf.mxu0 }
 0x15c   : > { %v3695_v44 = vpop.f32.mrf.mxu1 }
 0x15d   : > { %4046 = vst [vmem:[#allocation42_spill] sm:$0xff] %v3695_v44  ;;  %v3697_v5 = vpop.f32.mrf.mxu0 }
 0x15e   : > { %v2738_v37 = vpop.f32.mrf.mxu1 }
 0x15f   : > { %v2682_v46 = vpop.f32.mrf.mxu0 }
 0x160   : > { %v1688_v53 = vadd.f32 %v2682_v46, %v1359_v10  ;;  %v1942_v52 = vpop.f32.mrf.mxu1  ;;  %v1367_v46 = vadd.f32 %v3581_v19, %v1071_v50  ;;  %v1085_v10 = vadd.f32 %v3591_v49, %v3495_v15 }
 0x161   : > { %v1681_v34 = vpop.f32.mrf.mxu0 }
 0x162   : > { %v1949_v41 = vadd.f32 %v2738_v37, %v1688_v53  ;;  %v1682_v7 = vadd.f32 %v1681_v34, %v1351_v59  ;;  %v2741_v2 = vpop.f32.mrf.mxu1  ;;  %v1383_v15 = vadd.f32 %v3589_v40, %v1085_v10 }
 0x163   : > { %v2685_v0 = vpop.f32.mrf.mxu0 }
 0x164   : > { %2133 = vst.msk [vmem:[%s3709_s4 + $0x8] sm:$0xff] %vm217_vm0, %v1949_v41  ;;  %v1943_v56 = vadd.f32 %v1942_v52, %v1682_v7  ;;  %v1700_v36 = vadd.f32 %v2685_v0, %v1375_v8  ;;  %v1954_v26 = vpop.f32.mrf.mxu1  ;;  %v1099_v52 = vadd.f32 %v3599_v63, %v3501_v6  ;;  %v1113_v63 = vadd.f32 %v3607_v9, %v3507_v20 }
 0x165   : > { %v1693_v44 = vpop.f32.mrf.mxu0  ;;  %v1127_v9 = vadd.f32 %v3615_v21, %v3513_v23  ;;  %v1141_v21 = vadd.f32 %v3623_v29, %v3519_v62  ;;  %v1155_v29 = vadd.f32 %v3631_v43, %v3525_v61  ;;  %v1169_v43 = vadd.f32 %v3639_v22, %v3531_v38  ;;  %v4050_v22 = vld [vmem:[#allocation3_spill] sm:$0xff] }
 0x166   : > { %2132 = vst.msk [vmem:[%s3709_s4] sm:$0xff] %vm217_vm0, %v1943_v56  ;;  %v1961_v59 = vadd.f32 %v2741_v2, %v1700_v36  ;;  %v1694_v37 = vadd.f32 %v1693_v44, %v1367_v46  ;;  %v2744_v60 = vpop.f32.mrf.mxu1  ;;  %v1120_v44 = vadd.f32 %v3603_v58, %v3504_v1  ;;  %v1399_v6 = vadd.f32 %v3597_v25, %v1099_v52 }
 0x167   : > { %v2688_v19 = vpop.f32.mrf.mxu0  ;;  %v1134_v58 = vadd.f32 %v3611_v31, %v3510_v27  ;;  %v1415_v20 = vadd.f32 %v3605_v55, %v1113_v63  ;;  %v1148_v31 = vadd.f32 %v3619_v18, %v3516_v11  ;;  %v1431_v23 = vadd.f32 %v3613_v24, %v1127_v9 }
 0x168   : > { %2135 = vst.msk [vmem:[%s3709_s4 + $0x18] sm:$0xff] %vm217_vm0, %v1961_v59  ;;  %v1955_v30 = vadd.f32 %v1954_v26, %v1694_v37  ;;  %v1712_v35 = vadd.f32 %v2688_v19, %v1391_v39  ;;  %v1966_v49 = vpop.f32.mrf.mxu1  ;;  %v1423_v1 = vadd.f32 %v3601_v45, %v1120_v44  ;;  %v1162_v18 = vadd.f32 %v3627_v12, %v3522_v28 }
 0x169   : > { %v1705_v50 = vpop.f32.mrf.mxu0  ;;  %v1439_v27 = vadd.f32 %v3609_v42, %v1134_v58  ;;  %v1455_v11 = vadd.f32 %v3617_v57, %v1148_v31  ;;  %v1447_v62 = vadd.f32 %v3621_v51, %v1141_v21  ;;  %v1176_v12 = vadd.f32 %v3635_v14, %v3528_v47  ;;  %v4047_v14 = vld [vmem:[#allocation2_spill] sm:$0xff] }
 0x16a   : > { %2134 = vst.msk [vmem:[%s3709_s4 + $0x10] sm:$0xff] %vm217_vm0, %v1955_v30  ;;  %v1973_v17 = vadd.f32 %v2744_v60, %v1712_v35  ;;  %v1706_v40 = vadd.f32 %v1705_v50, %v1383_v15  ;;  %v2747_v53 = vpop.f32.mrf.mxu1  ;;  %v1471_v28 = vadd.f32 %v3625_v3, %v1162_v18  ;;  %v1463_v61 = vadd.f32 %v3629_v13, %v1155_v29 }
 0x16b   : > { %v2691_v34 = vpop.f32.mrf.mxu0  ;;  %v1487_v47 = vadd.f32 %v3633_v54, %v1176_v12 }
 0x16c   : > { %2137 = vst.msk [vmem:[%s3709_s4 + $0x28] sm:$0xff] %vm217_vm0, %v1973_v17  ;;  %v1967_v8 = vadd.f32 %v1966_v49, %v1706_v40  ;;  %v1724_v32 = vadd.f32 %v2691_v34, %v1407_v48  ;;  %v1978_v33 = vpop.f32.mrf.mxu1 }
 0x16d   : > { %v1717_v41 = vpop.f32.mrf.mxu0 }
 0x16e   : > { %2136 = vst.msk [vmem:[%s3709_s4 + $0x20] sm:$0xff] %vm217_vm0, %v1967_v8  ;;  %v1985_v7 = vadd.f32 %v2747_v53, %v1724_v32  ;;  %v1718_v25 = vadd.f32 %v1717_v41, %v1399_v6  ;;  %v2750_v2 = vpop.f32.mrf.mxu1  ;;  %v4048_v53 = vld [vmem:[#allocation18_spill] sm:$0xff]  ;;  %v4049_v32 = vld [vmem:[#allocation16_spill] sm:$0xff] }
 0x16f   : > { %v2694_v0 = vpop.f32.mrf.mxu0  ;;  %v1190_v34 = vadd.f32 %v4048_v53, %v4047_v14  ;;  %v1479_v38 = vadd.f32 %v4049_v32, %v1169_v43  ;;  %v4068_v53 = vld [vmem:[#allocation9_spill] sm:$0xff] }
 0x170   : > { %2139 = vst.msk [vmem:[%s3709_s4 + $0x38] sm:$0xff] %vm217_vm0, %v1985_v7  ;;  %v1979_v46 = vadd.f32 %v1978_v33, %v1718_v25  ;;  %v1736_v45 = vadd.f32 %v2694_v0, %v1423_v1  ;;  %v1990_v10 = vpop.f32.mrf.mxu1  ;;  %v4051_v33 = vld [vmem:[#allocation20_spill] sm:$0xff]  ;;  %v4052_v25 = vld [vmem:[#allocation17_spill] sm:$0xff] }
 0x171   : > { %v1729_v56 = vpop.f32.mrf.mxu0  ;;  %v1183_v41 = vadd.f32 %v4051_v33, %v4050_v22  ;;  %v4053_v0 = vld [vmem:[#allocation4_spill] sm:$0xff]  ;;  %v4071_v33 = vld [vmem:[#allocation10_spill] sm:$0xff] }
 0x172   : > { %2138 = vst.msk [vmem:[%s3709_s4 + $0x30] sm:$0xff] %vm217_vm0, %v1979_v46  ;;  %v1997_v36 = vadd.f32 %v2750_v2, %v1736_v45  ;;  %v1730_v55 = vadd.f32 %v1729_v56, %v1415_v20  ;;  %v2753_v26 = vpop.f32.mrf.mxu1  ;;  %v1503_v2 = vadd.f32 %v4052_v25, %v1190_v34  ;;  %v4054_v20 = vld [vmem:[#allocation22_spill] sm:$0xff]  ;;  %v4069_v34 = vld [vmem:[#allocation32_spill] sm:$0xff] }
 0x173   : > { %v2697_v39 = vpop.f32.mrf.mxu0  ;;  %v1204_v9 = vadd.f32 %v4054_v20, %v4053_v0  ;;  %v4074_v20 = vld [vmem:[#allocation11_spill] sm:$0xff] }
 0x174   : > { %2141 = vst.msk [vmem:[%s3709_s4 + $0x48] sm:$0xff] %vm217_vm0, %v1997_v36  ;;  %v1991_v4 = vadd.f32 %v1990_v10, %v1730_v55  ;;  %v1748_v42 = vadd.f32 %v2697_v39, %v1439_v27  ;;  %v2002_v59 = vpop.f32.mrf.mxu1  ;;  %v4055_v27 = vld [vmem:[#allocation19_spill] sm:$0xff]  ;;  %v4056_v36 = vld [vmem:[#allocation5_spill] sm:$0xff]  ;;  %v4057_v55 = vld [vmem:[#allocation24_spill] sm:$0xff] }
 0x175   : > { %v1741_v37 = vpop.f32.mrf.mxu0  ;;  %v1495_v31 = vadd.f32 %v4055_v27, %v1183_v41  ;;  %v4072_v41 = vld [vmem:[#allocation34_spill] sm:$0xff] }
 0x176   : > { %2140 = vst.msk [vmem:[%s3709_s4 + $0x40] sm:$0xff] %vm217_vm0, %v1991_v4  ;;  %v2009_v60 = vadd.f32 %v2753_v26, %v1748_v42  ;;  %v1742_v24 = vadd.f32 %v1741_v37, %v1431_v23  ;;  %v2756_v19 = vpop.f32.mrf.mxu1  ;;  %v1197_v26 = vadd.f32 %v4057_v55, %v4056_v36  ;;  %v4058_v42 = vld [vmem:[#allocation21_spill] sm:$0xff]  ;;  %v4059_v37 = vld [vmem:[#allocation6_spill] sm:$0xff]  ;;  %v4077_v55 = vld [vmem:[#allocation12_spill] sm:$0xff] }
 0x177   : > { %v2700_v15 = vpop.f32.mrf.mxu0 }
 0x178   : > { %2143 = vst.msk [vmem:[%s3709_s4 + $0x58] sm:$0xff] %vm217_vm0, %v2009_v60  ;;  %v2003_v52 = vadd.f32 %v2002_v59, %v1742_v24  ;;  %v1760_v57 = vadd.f32 %v2700_v15, %v1455_v11  ;;  %v2014_v30 = vpop.f32.mrf.mxu1  ;;  %v1519_v59 = vadd.f32 %v4058_v42, %v1204_v9  ;;  %v4060_v11 = vld [vmem:[#allocation26_spill] sm:$0xff]  ;;  %v4075_v9 = vld [vmem:[#allocation36_spill] sm:$0xff] }
 0x179   : > { %v1753_v35 = vpop.f32.mrf.mxu0  ;;  %v1218_v18 = vadd.f32 %v4060_v11, %v4059_v37  ;;  %v4080_v11 = vld [vmem:[#allocation13_spill] sm:$0xff] }
 0x17a   : > { %2142 = vst.msk [vmem:[%s3709_s4 + $0x50] sm:$0xff] %vm217_vm0, %v2003_v52  ;;  %v2021_v49 = vadd.f32 %v2756_v19, %v1760_v57  ;;  %v1754_v51 = vadd.f32 %v1753_v35, %v1447_v62  ;;  %v2759_v50 = vpop.f32.mrf.mxu1  ;;  %v4061_v62 = vld [vmem:[#allocation23_spill] sm:$0xff]  ;;  %v4063_v57 = vld [vmem:[#allocation28_spill] sm:$0xff] }
 0x17b   : > { %v2703_v48 = vpop.f32.mrf.mxu0  ;;  %v1511_v29 = vadd.f32 %v4061_v62, %v1197_v26  ;;  %v4062_v52 = vld [vmem:[#allocation7_spill] sm:$0xff]  ;;  %v4078_v26 = vld [vmem:[#allocation38_spill] sm:$0xff] }
 0x17c   : > { %2145 = vst.msk [vmem:[%s3709_s4 + $0x68] sm:$0xff] %vm217_vm0, %v2021_v49  ;;  %v2015_v44 = vadd.f32 %v2014_v30, %v1754_v51  ;;  %v1772_v3 = vadd.f32 %v2703_v48, %v1471_v28  ;;  %v2026_v17 = vpop.f32.mrf.mxu1  ;;  %v1211_v30 = vadd.f32 %v4063_v57, %v4062_v52  ;;  %v4064_v51 = vld [vmem:[#allocation25_spill] sm:$0xff]  ;;  %v4065_v48 = vld [vmem:[#allocation8_spill] sm:$0xff]  ;;  %v4083_v57 = vld [vmem:[#allocation14_spill] sm:$0xff] }
 0x17d   : > { %v1765_v40 = vpop.f32.mrf.mxu0 }
 0x17e   : > { %2144 = vst.msk [vmem:[%s3709_s4 + $0x60] sm:$0xff] %vm217_vm0, %v2015_v44  ;;  %v2033_v6 = vadd.f32 %v2759_v50, %v1772_v3  ;;  %v1766_v13 = vadd.f32 %v1765_v40, %v1463_v61  ;;  %v2762_v63 = vpop.f32.mrf.mxu1  ;;  %v1535_v50 = vadd.f32 %v4064_v51, %v1218_v18  ;;  %v4066_v61 = vld [vmem:[#allocation30_spill] sm:$0xff]  ;;  %v4081_v18 = vld [vmem:[#allocation40_spill] sm:$0xff]  ;;  %v4084_v51 = vld [vmem:[#allocation39_spill] sm:$0xff] }
 0x17f   : > { %v2706_v8 = vpop.f32.mrf.mxu0  ;;  %v1232_v43 = vadd.f32 %v4066_v61, %v4065_v48  ;;  %v4085_v48 = vld [vmem:[#allocation15_spill] sm:$0xff] }
 0x180   : > { %2147 = vst.msk [vmem:[%s3709_s4 + $0x78] sm:$0xff] %vm217_vm0, %v2033_v6  ;;  %v2027_v1 = vadd.f32 %v2026_v17, %v1766_v13  ;;  %v1784_v54 = vadd.f32 %v2706_v8, %v1487_v47  ;;  %v2038_v58 = vpop.f32.mrf.mxu1  ;;  %v4067_v47 = vld [vmem:[#allocation27_spill] sm:$0xff]  ;;  %v1225_v6 = vadd.f32 %v4069_v34, %v4068_v53  ;;  %v1267_v61 = vadd.f32 %v3697_v5, %v4085_v48 }
 0x181   : > { %v1777_v7 = vpop.f32.mrf.mxu0  ;;  %v1527_v14 = vadd.f32 %v4067_v47, %v1211_v30  ;;  %v1274_v30 = vadd.f32 %v3692_v16, %v4083_v57  ;;  %v4086_v16 = vld [vmem:[#allocation41_spill] sm:$0xff] }
 0x182   : > { %2146 = vst.msk [vmem:[%s3709_s4 + $0x70] sm:$0xff] %vm217_vm0, %v2027_v1  ;;  %v2045_v46 = vadd.f32 %v2762_v63, %v1784_v54  ;;  %v1778_v45 = vadd.f32 %v1777_v7, %v1479_v38  ;;  %v2765_v10 = vpop.f32.mrf.mxu1  ;;  %v4070_v38 = vld [vmem:[#allocation29_spill] sm:$0xff]  ;;  %v1246_v1 = vadd.f32 %v4072_v41, %v4071_v33 }
 0x183   : > { %v2709_v56 = vpop.f32.mrf.mxu0  ;;  %v1551_v22 = vadd.f32 %v4070_v38, %v1232_v43 }
 0x184   : > { %2149 = vst.msk [vmem:[%s3709_s4 + $0x88] sm:$0xff] %vm217_vm0, %v2045_v46  ;;  %v2039_v39 = vadd.f32 %v2038_v58, %v1778_v45  ;;  %v1796_v23 = vadd.f32 %v2709_v56, %v1503_v2  ;;  %v2050_v21 = vpop.f32.mrf.mxu1  ;;  %v4073_v2 = vld [vmem:[#allocation31_spill] sm:$0xff]  ;;  %v1239_v46 = vadd.f32 %v4075_v9, %v4074_v20 }
 0x185   : > { %v1789_v4 = vpop.f32.mrf.mxu0  ;;  %v1543_v0 = vadd.f32 %v4073_v2, %v1225_v6  ;;  %v4087_v6 = vld [vmem:[#allocation42_spill] sm:$0xff] }
 0x186   : > { %2148 = vst.msk [vmem:[%s3709_s4 + $0x80] sm:$0xff] %vm217_vm0, %v2039_v39  ;;  %v2057_v60 = vadd.f32 %v2765_v10, %v1796_v23  ;;  %v1790_v24 = vadd.f32 %v1789_v4, %v1495_v31  ;;  %v2768_v19 = vpop.f32.mrf.mxu1  ;;  %v4076_v31 = vld [vmem:[#allocation33_spill] sm:$0xff]  ;;  %v1260_v39 = vadd.f32 %v4078_v26, %v4077_v55 }
 0x187   : > { %v2712_v15 = vpop.f32.mrf.mxu0  ;;  %v1567_v36 = vadd.f32 %v4076_v31, %v1246_v1 }
 0x188   : > { %2151 = vst.msk [vmem:[%s3709_s4 + $0x98] sm:$0xff] %vm217_vm0, %v2057_v60  ;;  %v2051_v35 = vadd.f32 %v2050_v21, %v1790_v24  ;;  %v1808_v28 = vadd.f32 %v2712_v15, %v1519_v59  ;;  %v2062_v12 = vpop.f32.mrf.mxu1  ;;  %v4079_v59 = vld [vmem:[#allocation35_spill] sm:$0xff]  ;;  %v1253_v60 = vadd.f32 %v4081_v18, %v4080_v11 }
 0x189   : > { %v1801_v49 = vpop.f32.mrf.mxu0  ;;  %v1559_v37 = vadd.f32 %v4079_v59, %v1239_v46 }
 0x18a   : > { %2150 = vst.msk [vmem:[%s3709_s4 + $0x90] sm:$0xff] %vm217_vm0, %v2051_v35  ;;  %v2069_v44 = vadd.f32 %v2768_v19, %v1808_v28  ;;  %v1802_v3 = vadd.f32 %v1801_v49, %v1511_v29  ;;  %v2771_v17 = vpop.f32.mrf.mxu1  ;;  %v4082_v29 = vld [vmem:[#allocation37_spill] sm:$0xff] }
 0x18b   : > { %v2715_v40 = vpop.f32.mrf.mxu0  ;;  %v1583_v52 = vadd.f32 %v4082_v29, %v1260_v39 }
 0x18c   : > { %2153 = vst.msk [vmem:[%s3709_s4 + $0xa8] sm:$0xff] %vm217_vm0, %v2069_v44  ;;  %v2063_v13 = vadd.f32 %v2062_v12, %v1802_v3  ;;  %v1820_v63 = vadd.f32 %v2715_v40, %v1535_v50  ;;  %v2074_v8 = vpop.f32.mrf.mxu1  ;;  %v1575_v50 = vadd.f32 %v4084_v51, %v1253_v60  ;;  %v1599_v40 = vadd.f32 %v4086_v16, %v1274_v30 }
 0x18d   : > { %v1813_v32 = vpop.f32.mrf.mxu0 }
 0x18e   : > { %2152 = vst.msk [vmem:[%s3709_s4 + $0xa0] sm:$0xff] %vm217_vm0, %v2063_v13  ;;  %v2081_v54 = vadd.f32 %v2771_v17, %v1820_v63  ;;  %v1814_v58 = vadd.f32 %v1813_v32, %v1527_v14  ;;  %v2774_v7 = vpop.f32.mrf.mxu1  ;;  %v1591_v13 = vadd.f32 %v4087_v6, %v1267_v61 }
 0x18f   : > { %v2718_v25 = vpop.f32.mrf.mxu0 }
 0x190   : > { %2155 = vst.msk [vmem:[%s3709_s4 + $0xb8] sm:$0xff] %vm217_vm0, %v2081_v54  ;;  %v2075_v45 = vadd.f32 %v2074_v8, %v1814_v58  ;;  %v1832_v10 = vadd.f32 %v2718_v25, %v1551_v22  ;;  %v2086_v56 = vpop.f32.mrf.mxu1 }
 0x191   : > { %v1825_v27 = vpop.f32.mrf.mxu0 }
 0x192   : > { %2154 = vst.msk [vmem:[%s3709_s4 + $0xb0] sm:$0xff] %vm217_vm0, %v2075_v45  ;;  %v2093_v23 = vadd.f32 %v2774_v7, %v1832_v10  ;;  %v1826_v21 = vadd.f32 %v1825_v27, %v1543_v0  ;;  %v2777_v4 = vpop.f32.mrf.mxu1 }
 0x193   : > { %v2721_v42 = vpop.f32.mrf.mxu0 }
 0x194   : > { %2157 = vst.msk [vmem:[%s3709_s4 + $0xc8] sm:$0xff] %vm217_vm0, %v2093_v23  ;;  %v2087_v24 = vadd.f32 %v2086_v56, %v1826_v21  ;;  %v1844_v19 = vadd.f32 %v2721_v42, %v1567_v36  ;;  %v2098_v15 = vpop.f32.mrf.mxu1 }
 0x195   : > { %v1837_v62 = vpop.f32.mrf.mxu0 }
 0x196   : > { %2156 = vst.msk [vmem:[%s3709_s4 + $0xc0] sm:$0xff] %vm217_vm0, %v2087_v24  ;;  %v2105_v35 = vadd.f32 %v2777_v4, %v1844_v19  ;;  %v1838_v28 = vadd.f32 %v1837_v62, %v1559_v37  ;;  %v2780_v12 = vpop.f32.mrf.mxu1 }
 0x197   : > { %v2724_v49 = vpop.f32.mrf.mxu0 }
 0x198   : > { %2159 = vst.msk [vmem:[%s3709_s4 + $0xd8] sm:$0xff] %vm217_vm0, %v2105_v35  ;;  %v2099_v43 = vadd.f32 %v2098_v15, %v1838_v28  ;;  %v1856_v44 = vadd.f32 %v2724_v49, %v1583_v52  ;;  %v2110_v3 = vpop.f32.mrf.mxu1 }
 0x199   : > { %v1849_v17 = vpop.f32.mrf.mxu0 }
 0x19a   : > { %2158 = vst.msk [vmem:[%s3709_s4 + $0xd0] sm:$0xff] %vm217_vm0, %v2099_v43  ;;  %v2117_v47 = vadd.f32 %v2780_v12, %v1856_v44  ;;  %v1850_v14 = vadd.f32 %v1849_v17, %v1575_v50  ;;  %v2783_v34 = vpop.f32.mrf.mxu1 }
 0x19b   : > { %v2727_v53 = vpop.f32.mrf.mxu0 }
 0x19c   : > { %2161 = vst.msk [vmem:[%s3709_s4 + $0xe8] sm:$0xff] %vm217_vm0, %v2117_v47  ;;  %v2111_v5 = vadd.f32 %v2110_v3, %v1850_v14  ;;  %v1868_v63 = vadd.f32 %v2727_v53, %v1599_v40  ;;  %v2122_v22 = vpop.f32.mrf.mxu1 }
 0x19d   : > { %v1861_v8 = vpop.f32.mrf.mxu0 }
 0x19e   : > { %2160 = vst.msk [vmem:[%s3709_s4 + $0xe0] sm:$0xff] %vm217_vm0, %v2111_v5  ;;  %v2129_v32 = vadd.f32 %v2783_v34, %v1868_v63  ;;  %v1862_v38 = vadd.f32 %v1861_v8, %v1591_v13 }
 0x1a0   : > { %2163 = vst.msk [vmem:[%s3709_s4 + $0xf8] sm:$0xff] %vm217_vm0, %v2129_v32  ;;  %v2123_v33 = vadd.f32 %v2122_v22, %v1862_v38 }
 0x1a2   : > { %2162 = vst.msk [vmem:[%s3709_s4 + $0xf0] sm:$0xff] %vm217_vm0, %v2123_v33 }
 0x1a3 PF: > { %s13_s12 = sadd.s32 1, %s2798_s12  }
 0x1a4   : > { %p10_p4 = scmp.ge.s32.totalorder %s13_s12, 4  }
 0x1a6   :  { %12 = sbr.rel (!%p10_p4) target bundleno = 1 (0x1), region = 62 }

</bundles_post_ra>
